<compile_context>
chip_gen: v5e
topology: v5e:2x2
jax: 0.10.0
libtpu: 0.0.40
codegen_flags: <defaults>
</compile_context>

<pallas_src>
import math

import jax
import jax.numpy as jnp
from jax.experimental import pallas as pl
from jax.experimental.pallas import tpu as pltpu


LATENT = 16
NODE_OUT = 3
EDGE_OUT = 3
D_NODE_EMB = 12   # node embedder output width implied by Linear(12 + 6 + 12, ...)
D_EDGE_EMB = 6    # edge embedder output width implied by Linear(12 + 6 + 12, ...)
OUT_PAD = 128     # lane-dense final-output width (sliced back to 3 in the wrapper)


# ----------------------------------------------------------------------------
# Fused Pallas kernel: all three GraknConv layers in one invocation
# ----------------------------------------------------------------------------
def build_fused_kernel(layer_cfgs):
    """Builds the fused kernel.

    Ref order (inputs): src[1,E], dst[1,E], x[N,dx], e[E,de], then per layer:
      edge net: Ws, We, Wd, b0, then (W,b) * (n_edge-1)
      node net: Wx, Wm, b0, then (W,b) * (n_node-1)
    Ref order (outputs): node_out[N,OUT_PAD], edge_out[E,OUT_PAD]
    """

    def kernel(*refs):
        src_ref, dst_ref, x_ref, e_ref = refs[0], refs[1], refs[2], refs[3]
        idx = 4
        layers = []
        for cfg in layer_cfgs:
            Ws = refs[idx][...]; We = refs[idx + 1][...]; Wd = refs[idx + 2][...]
            be0 = refs[idx + 3][...]
            idx += 4
            e_rest = []
            for _ in range(cfg["n_edge"] - 1):
                e_rest.append((refs[idx][...], refs[idx + 1][...]))
                idx += 2
            Wx = refs[idx][...]; Wm = refs[idx + 1][...]; bn0 = refs[idx + 2][...]
            idx += 3
            n_rest = []
            for _ in range(cfg["n_node"] - 1):
                n_rest.append((refs[idx][...], refs[idx + 1][...]))
                idx += 2
            layers.append((Ws, We, Wd, be0, e_rest, Wx, Wm, bn0, n_rest, cfg))
        node_out_ref = refs[idx]
        edge_out_ref = refs[idx + 1]

        x = x_ref[...]            # [N, dx] f32
        e = e_ref[...]            # [E, de] f32
        src = src_ref[...]        # [1, E] i32
        dst = dst_ref[...]        # [1, E] i32
        N = x.shape[0]
        E = e.shape[0]

        # --- hoisted: transposed one-hots [N, E] + adjacency [N, N], built once ---
        # NOTE: out-of-range src/dst indices silently map to zero rows/columns
        # (gather zeros, scatter nowhere). Valid indices are a precondition.
        node_iota = jax.lax.broadcasted_iota(jnp.int32, (N, E), 0)      # [N, E]
        oh_srcT = (node_iota == src).astype(jnp.float32)                # [N, E]
        oh_dstT = (node_iota == dst).astype(jnp.float32)                # [N, E]
        adj = jax.lax.dot_general(                                      # [N, N]
            oh_dstT, oh_srcT, (((1,), (1,)), ((), ())),
            preferred_element_type=jnp.float32)

        for (Ws, We, Wd, be0, e_rest, Wx, Wm, bn0, n_rest, cfg) in layers:
            edge_relu = cfg["edge_relu"]
            node_relu = cfg["node_relu"]

            # --- edge MLP: project-then-gather (split first weight in 3) ---
            xWs = jnp.dot(x, Ws, preferred_element_type=jnp.float32)    # [N, H]
            xWd = jnp.dot(x, Wd, preferred_element_type=jnp.float32)    # [N, H]
            h_src = jax.lax.dot_general(                                # [E, H]
                oh_srcT, xWs, (((0,), (0,)), ((), ())),
                preferred_element_type=jnp.float32)
            h_dst = jax.lax.dot_general(                                # [E, H]
                oh_dstT, xWd, (((0,), (0,)), ((), ())),
                preferred_element_type=jnp.float32)
            h = (h_src
                 + jnp.dot(e, We, preferred_element_type=jnp.float32)
                 + h_dst + be0)
            if edge_relu[0]:
                h = jnp.maximum(h, 0.0)
            for k, (W, b) in enumerate(e_rest):
                h = jnp.dot(h, W, preferred_element_type=jnp.float32) + b
                if edge_relu[k + 1]:
                    h = jnp.maximum(h, 0.0)
            edge_repr = h

            # --- aggregation (scatter-add by dst) + node MLP (split weight in 2) ---
            xWx = jnp.dot(x, Wx, preferred_element_type=jnp.float32)    # [N, H]
            agg_x = jnp.dot(adj, xWx, preferred_element_type=jnp.float32)         # [N, H]
            agg_m = jnp.dot(oh_dstT, edge_repr, preferred_element_type=jnp.float32)  # [N, d_e]
            g = (agg_x
                 + jnp.dot(agg_m, Wm, preferred_element_type=jnp.float32)
                 + bn0)
            if node_relu[0]:
                g = jnp.maximum(g, 0.0)
            for k, (W, b) in enumerate(n_rest):
                g = jnp.dot(g, W, preferred_element_type=jnp.float32) + b
                if node_relu[k + 1]:
                    g = jnp.maximum(g, 0.0)

            x = g
            e = edge_repr

        # Lane-dense final stores (x is [N, OUT_PAD], e is [E, OUT_PAD]).
        node_out_ref[...] = x
        edge_out_ref[...] = e

    return kernel


def _cost_estimate(N, E, layer_cfgs):
    H = LATENT
    flops = 2 * N * E * N                      # adjacency
    for cfg in layer_cfgs:
        flops += 2 * 2 * E * N * H             # gathers of projected features
        flops += 2 * N * N * H                 # adj @ (x @ Wx)
        flops += 2 * N * E * OUT_PAD           # agg_m (upper bound)
        flops += (cfg["n_edge"] + cfg["n_node"] + 2) * 2 * max(E, N) * H * OUT_PAD
    bytes_accessed = 4 * (N * D_NODE_EMB + E * D_EDGE_EMB
                          + (N + E) * OUT_PAD + 2 * E)
    return pl.CostEstimate(flops=int(flops), transcendentals=0,
                           bytes_accessed=int(bytes_accessed))


# ----------------------------------------------------------------------------
# Parameter init (deterministic, PyTorch nn.Linear default U(-1/sqrt(fan_in), ..))
# ----------------------------------------------------------------------------
def linear_init(key, fan_in, fan_out):
    kw, kb = jax.random.split(key)
    bound = 1.0 / math.sqrt(fan_in)
    W = jax.random.uniform(kw, (fan_in, fan_out), jnp.float32, -bound, bound)
    b = jax.random.uniform(kb, (1, fan_out), jnp.float32, -bound, bound)
    return W, b


def split_linear_init(key, in_sizes, fan_out):
    fan_in = sum(in_sizes)
    W, b = linear_init(key, fan_in, fan_out)
    splits = []
    off = 0
    for s in in_sizes:
        splits.append(W[off:off + s, :])
        off += s
    return splits, b


def init_params(key, f_node_in, f_edge_in):
    ks = jax.random.split(key, 16)
    p = {}
    # TODO(synk): Embedder class is not provided in the source; approximated as a
    # deterministic linear projection to the documented embedding widths (12 node, 6 edge).
    p["node_emb"] = linear_init(ks[0], f_node_in, D_NODE_EMB)
    p["edge_emb"] = linear_init(ks[1], f_edge_in, D_EDGE_EMB)

    # conv1: nn_edge = Linear(12+6+12,16),ReLU,Linear(16,16),ReLU
    (Ws, We, Wd), b0 = split_linear_init(ks[2], (D_NODE_EMB, D_EDGE_EMB, D_NODE_EMB), LATENT)
    W2, b2 = linear_init(ks[3], LATENT, LATENT)
    p["conv1_edge"] = {"Ws": Ws, "We": We, "Wd": Wd, "b0": b0, "rest": [(W2, b2)]}
    #        nn_node = Linear(12+16,16),ReLU,Linear(16,16),ReLU
    (Wx, Wm), bn0 = split_linear_init(ks[4], (D_NODE_EMB, LATENT), LATENT)
    Wn2, bn2 = linear_init(ks[5], LATENT, LATENT)
    p["conv1_node"] = {"Wx": Wx, "Wm": Wm, "b0": bn0, "rest": [(Wn2, bn2)]}

    # conv2: nn_edge = Linear(48,16),ReLU,Linear(16,16),ReLU
    (Ws, We, Wd), b0 = split_linear_init(ks[6], (LATENT, LATENT, LATENT), LATENT)
    W2, b2 = linear_init(ks[7], LATENT, LATENT)
    p["conv2_edge"] = {"Ws": Ws, "We": We, "Wd": Wd, "b0": b0, "rest": [(W2, b2)]}
    #        nn_node = Linear(32,16),ReLU,Linear(16,16),ReLU
    (Wx, Wm), bn0 = split_linear_init(ks[8], (LATENT, LATENT), LATENT)
    Wn2, bn2 = linear_init(ks[9], LATENT, LATENT)
    p["conv2_node"] = {"Wx": Wx, "Wm": Wm, "b0": bn0, "rest": [(Wn2, bn2)]}

    # conv3: nn_edge = Linear(48,16),ReLU,Linear(16,16),ReLU,Linear(16,3)
    (Ws, We, Wd), b0 = split_linear_init(ks[10], (LATENT, LATENT, LATENT), LATENT)
    W2, b2 = linear_init(ks[11], LATENT, LATENT)
    W3, b3 = linear_init(ks[12], LATENT, EDGE_OUT)
    p["conv3_edge"] = {"Ws": Ws, "We": We, "Wd": Wd, "b0": b0,
                       "rest": [(W2, b2), (W3, b3)]}
    #        nn_node = Linear(16+3,16),ReLU,Linear(16,16),ReLU,Linear(16,3)
    (Wx, Wm), bn0 = split_linear_init(ks[13], (LATENT, EDGE_OUT), LATENT)
    Wn2, bn2 = linear_init(ks[14], LATENT, LATENT)
    Wn3, bn3 = linear_init(ks[15], LATENT, NODE_OUT)
    p["conv3_node"] = {"Wx": Wx, "Wm": Wm, "b0": bn0,
                       "rest": [(Wn2, bn2), (Wn3, bn3)]}
    return p


# ----------------------------------------------------------------------------
# Full forward pass (embedder glue in plain JAX, all 3 convs in ONE Pallas call)
# ----------------------------------------------------------------------------
def kgcn_no_loopback_forward(params, x_node_raw, x_edge_raw, edge_index):
    # Embedders (approximated, see TODO above) — plain JAX glue.
    x_node = x_node_raw @ params["node_emb"][0] + params["node_emb"][1]
    x_edge = x_edge_raw @ params["edge_emb"][0] + params["edge_emb"][1]

    # Lane-dense int32 index rows.
    src_row = edge_index[0].astype(jnp.int32).reshape(1, -1)
    dst_row = edge_index[1].astype(jnp.int32).reshape(1, -1)

    # --- lane-dense output padding of the conv3 final linears (free plumbing) ---
    def pad_cols(W, b, width):
        return (jnp.pad(W, ((0, 0), (0, width - W.shape[1]))),
                jnp.pad(b, ((0, 0), (0, width - b.shape[1]))))

    p3e = dict(params["conv3_edge"])
    W3e, b3e = p3e["rest"][-1]
    W3e, b3e = pad_cols(W3e, b3e, OUT_PAD)               # [16,3] -> [16,128]
    p3e = {**p3e, "rest": p3e["rest"][:-1] + [(W3e, b3e)]}

    p3n = dict(params["conv3_node"])
    Wm3 = jnp.pad(p3n["Wm"], ((0, OUT_PAD - p3n["Wm"].shape[0]), (0, 0)))  # [3,16]->[128,16]
    W3n, b3n = p3n["rest"][-1]
    W3n, b3n = pad_cols(W3n, b3n, OUT_PAD)               # [16,3] -> [16,128]
    p3n = {**p3n, "Wm": Wm3, "rest": p3n["rest"][:-1] + [(W3n, b3n)]}

    layer_params = [
        (params["conv1_edge"], params["conv1_node"]),
        (params["conv2_edge"], params["conv2_node"]),
        (p3e, p3n),
    ]
    layer_cfgs = [
        dict(n_edge=2, n_node=2, edge_relu=(True, True), node_relu=(True, True)),
        dict(n_edge=2, n_node=2, edge_relu=(True, True), node_relu=(True, True)),
        dict(n_edge=3, n_node=3, edge_relu=(True, True, False),
             node_relu=(True, True, False)),
    ]

    flat_inputs = [src_row, dst_row, x_node, x_edge]
    for (pe, pn) in layer_params:
        flat_inputs += [pe["Ws"], pe["We"], pe["Wd"], pe["b0"]]
        for W, b in pe["rest"]:
            flat_inputs += [W, b]
        flat_inputs += [pn["Wx"], pn["Wm"], pn["b0"]]
        for W, b in pn["rest"]:
            flat_inputs += [W, b]

    N = x_node.shape[0]
    E = x_edge.shape[0]

    kernel = build_fused_kernel(layer_cfgs)

    node_pad, edge_pad = pl.pallas_call(
        kernel,
        out_shape=(jax.ShapeDtypeStruct((N, OUT_PAD), jnp.float32),
                   jax.ShapeDtypeStruct((E, OUT_PAD), jnp.float32)),
        in_specs=[pl.BlockSpec(memory_space=pltpu.MemorySpace.VMEM)] * len(flat_inputs),
        out_specs=(pl.BlockSpec(memory_space=pltpu.MemorySpace.VMEM),
                   pl.BlockSpec(memory_space=pltpu.MemorySpace.VMEM)),
        cost_estimate=_cost_estimate(N, E, layer_cfgs),
    )(*flat_inputs)

    return node_pad[:, :NODE_OUT], edge_pad[:, :EDGE_OUT]


# ----------------------------------------------------------------------------
# Pure-JAX reference (same math, segment_sum / take) for a sanity check
# ----------------------------------------------------------------------------
def _ref_conv(x, e, src, dst, edge_params, node_params, edge_relu, node_relu):
    N = x.shape[0]
    x_src = jnp.take(x, src, axis=0)
    x_dst = jnp.take(x, dst, axis=0)
    h = (x_src @ edge_params["Ws"] + e @ edge_params["We"]
         + x_dst @ edge_params["Wd"] + edge_params["b0"])
    if edge_relu[0]:
        h = jnp.maximum(h, 0.0)
    for k, (W, b) in enumerate(edge_params["rest"]):
        h = h @ W + b
        if edge_relu[k + 1]:
            h = jnp.maximum(h, 0.0)
    edge_repr = h
    agg_x = jax.ops.segment_sum(x_src, dst, num_segments=N)
    agg_m = jax.ops.segment_sum(edge_repr, dst, num_segments=N)
    g = agg_x @ node_params["Wx"] + agg_m @ node_params["Wm"] + node_params["b0"]
    if node_relu[0]:
        g = jnp.maximum(g, 0.0)
    for k, (W, b) in enumerate(node_params["rest"]):
        g = g @ W + b
        if node_relu[k + 1]:
            g = jnp.maximum(g, 0.0)
    return g, edge_repr


def reference_forward(params, x_node_raw, x_edge_raw, edge_index):
    x_node = x_node_raw @ params["node_emb"][0] + params["node_emb"][1]
    x_edge = x_edge_raw @ params["edge_emb"][0] + params["edge_emb"][1]
    src = edge_index[0].astype(jnp.int32)
    dst = edge_index[1].astype(jnp.int32)
    x_node, x_edge = _ref_conv(x_node, x_edge, src, dst,
                               params["conv1_edge"], params["conv1_node"],
                               (True, True), (True, True))
    x_node, x_edge = _ref_conv(x_node, x_edge, src, dst,
                               params["conv2_edge"], params["conv2_node"],
                               (True, True), (True, True))
    x_node, x_edge = _ref_conv(x_node, x_edge, src, dst,
                               params["conv3_edge"], params["conv3_node"],
                               (True, True, False), (True, True, False))
    return x_node, x_edge


if __name__ == "__main__":
    key = jax.random.PRNGKey(0)
    N, E = 8, 16
    F_NODE_IN, F_EDGE_IN = 7, 4

    kp, kx, ke, ks, kd = jax.random.split(key, 5)
    params = init_params(kp, F_NODE_IN, F_EDGE_IN)

    x_node_raw = jax.random.normal(kx, (N, F_NODE_IN), dtype=jnp.float32)
    x_edge_raw = jax.random.normal(ke, (E, F_EDGE_IN), dtype=jnp.float32)
    src = jax.random.randint(ks, (E,), 0, N, dtype=jnp.int32)
    dst = jax.random.randint(kd, (E,), 0, N, dtype=jnp.int32)
    edge_index = jnp.stack([src, dst], axis=0)   # [2, E]

    node_out, edge_out = kgcn_no_loopback_forward(params, x_node_raw, x_edge_raw, edge_index)
    jax.block_until_ready((node_out, edge_out))

    ref_node, ref_edge = reference_forward(params, x_node_raw, x_edge_raw, edge_index)
    assert node_out.shape == (N, NODE_OUT) and node_out.dtype == jnp.float32
    assert edge_out.shape == (E, EDGE_OUT) and edge_out.dtype == jnp.float32
    assert jnp.allclose(node_out, ref_node, atol=1e-4, rtol=1e-4)
    assert jnp.allclose(edge_out, ref_edge, atol=1e-4, rtol=1e-4)

    print("KERNEL_OK")
</pallas_src>

<mosaic_0001>
module attributes {stable_mosaic.version = 11 : i64} {
  func.func @kernel(%arg0: memref<1x16xi32, #tpu.memory_space<vmem>>, %arg1: memref<1x16xi32, #tpu.memory_space<vmem>>, %arg2: memref<8x12xf32, #tpu.memory_space<vmem>>, %arg3: memref<16x6xf32, #tpu.memory_space<vmem>>, %arg4: memref<12x16xf32, #tpu.memory_space<vmem>>, %arg5: memref<6x16xf32, #tpu.memory_space<vmem>>, %arg6: memref<12x16xf32, #tpu.memory_space<vmem>>, %arg7: memref<1x16xf32, #tpu.memory_space<vmem>>, %arg8: memref<16x16xf32, #tpu.memory_space<vmem>>, %arg9: memref<1x16xf32, #tpu.memory_space<vmem>>, %arg10: memref<12x16xf32, #tpu.memory_space<vmem>>, %arg11: memref<16x16xf32, #tpu.memory_space<vmem>>, %arg12: memref<1x16xf32, #tpu.memory_space<vmem>>, %arg13: memref<16x16xf32, #tpu.memory_space<vmem>>, %arg14: memref<1x16xf32, #tpu.memory_space<vmem>>, %arg15: memref<16x16xf32, #tpu.memory_space<vmem>>, %arg16: memref<16x16xf32, #tpu.memory_space<vmem>>, %arg17: memref<16x16xf32, #tpu.memory_space<vmem>>, %arg18: memref<1x16xf32, #tpu.memory_space<vmem>>, %arg19: memref<16x16xf32, #tpu.memory_space<vmem>>, %arg20: memref<1x16xf32, #tpu.memory_space<vmem>>, %arg21: memref<16x16xf32, #tpu.memory_space<vmem>>, %arg22: memref<16x16xf32, #tpu.memory_space<vmem>>, %arg23: memref<1x16xf32, #tpu.memory_space<vmem>>, %arg24: memref<16x16xf32, #tpu.memory_space<vmem>>, %arg25: memref<1x16xf32, #tpu.memory_space<vmem>>, %arg26: memref<16x16xf32, #tpu.memory_space<vmem>>, %arg27: memref<16x16xf32, #tpu.memory_space<vmem>>, %arg28: memref<16x16xf32, #tpu.memory_space<vmem>>, %arg29: memref<1x16xf32, #tpu.memory_space<vmem>>, %arg30: memref<16x16xf32, #tpu.memory_space<vmem>>, %arg31: memref<1x16xf32, #tpu.memory_space<vmem>>, %arg32: memref<16x128xf32, #tpu.memory_space<vmem>>, %arg33: memref<1x128xf32, #tpu.memory_space<vmem>>, %arg34: memref<16x16xf32, #tpu.memory_space<vmem>>, %arg35: memref<128x16xf32, #tpu.memory_space<vmem>>, %arg36: memref<1x16xf32, #tpu.memory_space<vmem>>, %arg37: memref<16x16xf32, #tpu.memory_space<vmem>>, %arg38: memref<1x16xf32, #tpu.memory_space<vmem>>, %arg39: memref<16x128xf32, #tpu.memory_space<vmem>>, %arg40: memref<1x128xf32, #tpu.memory_space<vmem>>, %arg41: memref<8x128xf32, #tpu.memory_space<vmem>>, %arg42: memref<16x128xf32, #tpu.memory_space<vmem>>) attributes {dimension_semantics = [], scalar_prefetch = 0 : i64, scratch_operands = 0 : i64, tpu.core_type = #tpu.core_type<tc>} {
    %c0 = arith.constant 0 : index
    %c0_0 = arith.constant 0 : index
    %0 = vector.load %arg4[%c0, %c0_0] : memref<12x16xf32, #tpu.memory_space<vmem>>, vector<12x16xf32>
    %c0_1 = arith.constant 0 : index
    %c0_2 = arith.constant 0 : index
    %1 = vector.load %arg5[%c0_1, %c0_2] : memref<6x16xf32, #tpu.memory_space<vmem>>, vector<6x16xf32>
    %c0_3 = arith.constant 0 : index
    %c0_4 = arith.constant 0 : index
    %2 = vector.load %arg6[%c0_3, %c0_4] : memref<12x16xf32, #tpu.memory_space<vmem>>, vector<12x16xf32>
    %c0_5 = arith.constant 0 : index
    %c0_6 = arith.constant 0 : index
    %3 = vector.load %arg7[%c0_5, %c0_6] : memref<1x16xf32, #tpu.memory_space<vmem>>, vector<1x16xf32>
    %c0_7 = arith.constant 0 : index
    %c0_8 = arith.constant 0 : index
    %4 = vector.load %arg8[%c0_7, %c0_8] : memref<16x16xf32, #tpu.memory_space<vmem>>, vector<16x16xf32>
    %c0_9 = arith.constant 0 : index
    %c0_10 = arith.constant 0 : index
    %5 = vector.load %arg9[%c0_9, %c0_10] : memref<1x16xf32, #tpu.memory_space<vmem>>, vector<1x16xf32>
    %c0_11 = arith.constant 0 : index
    %c0_12 = arith.constant 0 : index
    %6 = vector.load %arg10[%c0_11, %c0_12] : memref<12x16xf32, #tpu.memory_space<vmem>>, vector<12x16xf32>
    %c0_13 = arith.constant 0 : index
    %c0_14 = arith.constant 0 : index
    %7 = vector.load %arg11[%c0_13, %c0_14] : memref<16x16xf32, #tpu.memory_space<vmem>>, vector<16x16xf32>
    %c0_15 = arith.constant 0 : index
    %c0_16 = arith.constant 0 : index
    %8 = vector.load %arg12[%c0_15, %c0_16] : memref<1x16xf32, #tpu.memory_space<vmem>>, vector<1x16xf32>
    %c0_17 = arith.constant 0 : index
    %c0_18 = arith.constant 0 : index
    %9 = vector.load %arg13[%c0_17, %c0_18] : memref<16x16xf32, #tpu.memory_space<vmem>>, vector<16x16xf32>
    %c0_19 = arith.constant 0 : index
    %c0_20 = arith.constant 0 : index
    %10 = vector.load %arg14[%c0_19, %c0_20] : memref<1x16xf32, #tpu.memory_space<vmem>>, vector<1x16xf32>
    %c0_21 = arith.constant 0 : index
    %c0_22 = arith.constant 0 : index
    %11 = vector.load %arg15[%c0_21, %c0_22] : memref<16x16xf32, #tpu.memory_space<vmem>>, vector<16x16xf32>
    %c0_23 = arith.constant 0 : index
    %c0_24 = arith.constant 0 : index
    %12 = vector.load %arg16[%c0_23, %c0_24] : memref<16x16xf32, #tpu.memory_space<vmem>>, vector<16x16xf32>
    %c0_25 = arith.constant 0 : index
    %c0_26 = arith.constant 0 : index
    %13 = vector.load %arg17[%c0_25, %c0_26] : memref<16x16xf32, #tpu.memory_space<vmem>>, vector<16x16xf32>
    %c0_27 = arith.constant 0 : index
    %c0_28 = arith.constant 0 : index
    %14 = vector.load %arg18[%c0_27, %c0_28] : memref<1x16xf32, #tpu.memory_space<vmem>>, vector<1x16xf32>
    %c0_29 = arith.constant 0 : index
    %c0_30 = arith.constant 0 : index
    %15 = vector.load %arg19[%c0_29, %c0_30] : memref<16x16xf32, #tpu.memory_space<vmem>>, vector<16x16xf32>
    %c0_31 = arith.constant 0 : index
    %c0_32 = arith.constant 0 : index
    %16 = vector.load %arg20[%c0_31, %c0_32] : memref<1x16xf32, #tpu.memory_space<vmem>>, vector<1x16xf32>
    %c0_33 = arith.constant 0 : index
    %c0_34 = arith.constant 0 : index
    %17 = vector.load %arg21[%c0_33, %c0_34] : memref<16x16xf32, #tpu.memory_space<vmem>>, vector<16x16xf32>
    %c0_35 = arith.constant 0 : index
    %c0_36 = arith.constant 0 : index
    %18 = vector.load %arg22[%c0_35, %c0_36] : memref<16x16xf32, #tpu.memory_space<vmem>>, vector<16x16xf32>
    %c0_37 = arith.constant 0 : index
    %c0_38 = arith.constant 0 : index
    %19 = vector.load %arg23[%c0_37, %c0_38] : memref<1x16xf32, #tpu.memory_space<vmem>>, vector<1x16xf32>
    %c0_39 = arith.constant 0 : index
    %c0_40 = arith.constant 0 : index
    %20 = vector.load %arg24[%c0_39, %c0_40] : memref<16x16xf32, #tpu.memory_space<vmem>>, vector<16x16xf32>
    %c0_41 = arith.constant 0 : index
    %c0_42 = arith.constant 0 : index
    %21 = vector.load %arg25[%c0_41, %c0_42] : memref<1x16xf32, #tpu.memory_space<vmem>>, vector<1x16xf32>
    %c0_43 = arith.constant 0 : index
    %c0_44 = arith.constant 0 : index
    %22 = vector.load %arg26[%c0_43, %c0_44] : memref<16x16xf32, #tpu.memory_space<vmem>>, vector<16x16xf32>
    %c0_45 = arith.constant 0 : index
    %c0_46 = arith.constant 0 : index
    %23 = vector.load %arg27[%c0_45, %c0_46] : memref<16x16xf32, #tpu.memory_space<vmem>>, vector<16x16xf32>
    %c0_47 = arith.constant 0 : index
    %c0_48 = arith.constant 0 : index
    %24 = vector.load %arg28[%c0_47, %c0_48] : memref<16x16xf32, #tpu.memory_space<vmem>>, vector<16x16xf32>
    %c0_49 = arith.constant 0 : index
    %c0_50 = arith.constant 0 : index
    %25 = vector.load %arg29[%c0_49, %c0_50] : memref<1x16xf32, #tpu.memory_space<vmem>>, vector<1x16xf32>
    %c0_51 = arith.constant 0 : index
    %c0_52 = arith.constant 0 : index
    %26 = vector.load %arg30[%c0_51, %c0_52] : memref<16x16xf32, #tpu.memory_space<vmem>>, vector<16x16xf32>
    %c0_53 = arith.constant 0 : index
    %c0_54 = arith.constant 0 : index
    %27 = vector.load %arg31[%c0_53, %c0_54] : memref<1x16xf32, #tpu.memory_space<vmem>>, vector<1x16xf32>
    %c0_55 = arith.constant 0 : index
    %c0_56 = arith.constant 0 : index
    %28 = vector.load %arg32[%c0_55, %c0_56] : memref<16x128xf32, #tpu.memory_space<vmem>>, vector<16x128xf32>
    %c0_57 = arith.constant 0 : index
    %c0_58 = arith.constant 0 : index
    %29 = vector.load %arg33[%c0_57, %c0_58] : memref<1x128xf32, #tpu.memory_space<vmem>>, vector<1x128xf32>
    %c0_59 = arith.constant 0 : index
    %c0_60 = arith.constant 0 : index
    %30 = vector.load %arg34[%c0_59, %c0_60] : memref<16x16xf32, #tpu.memory_space<vmem>>, vector<16x16xf32>
    %c0_61 = arith.constant 0 : index
    %c0_62 = arith.constant 0 : index
    %31 = vector.load %arg35[%c0_61, %c0_62] : memref<128x16xf32, #tpu.memory_space<vmem>>, vector<128x16xf32>
    %c0_63 = arith.constant 0 : index
    %c0_64 = arith.constant 0 : index
    %32 = vector.load %arg36[%c0_63, %c0_64] : memref<1x16xf32, #tpu.memory_space<vmem>>, vector<1x16xf32>
    %c0_65 = arith.constant 0 : index
    %c0_66 = arith.constant 0 : index
    %33 = vector.load %arg37[%c0_65, %c0_66] : memref<16x16xf32, #tpu.memory_space<vmem>>, vector<16x16xf32>
    %c0_67 = arith.constant 0 : index
    %c0_68 = arith.constant 0 : index
    %34 = vector.load %arg38[%c0_67, %c0_68] : memref<1x16xf32, #tpu.memory_space<vmem>>, vector<1x16xf32>
    %c0_69 = arith.constant 0 : index
    %c0_70 = arith.constant 0 : index
    %35 = vector.load %arg39[%c0_69, %c0_70] : memref<16x128xf32, #tpu.memory_space<vmem>>, vector<16x128xf32>
    %c0_71 = arith.constant 0 : index
    %c0_72 = arith.constant 0 : index
    %36 = vector.load %arg40[%c0_71, %c0_72] : memref<1x128xf32, #tpu.memory_space<vmem>>, vector<1x128xf32>
    %c0_73 = arith.constant 0 : index
    %c0_74 = arith.constant 0 : index
    %37 = vector.load %arg2[%c0_73, %c0_74] : memref<8x12xf32, #tpu.memory_space<vmem>>, vector<8x12xf32>
    %c0_75 = arith.constant 0 : index
    %c0_76 = arith.constant 0 : index
    %38 = vector.load %arg3[%c0_75, %c0_76] : memref<16x6xf32, #tpu.memory_space<vmem>>, vector<16x6xf32>
    %c0_77 = arith.constant 0 : index
    %c0_78 = arith.constant 0 : index
    %39 = vector.load %arg0[%c0_77, %c0_78] : memref<1x16xi32, #tpu.memory_space<vmem>>, vector<1x16xi32>
    %c0_79 = arith.constant 0 : index
    %c0_80 = arith.constant 0 : index
    %40 = vector.load %arg1[%c0_79, %c0_80] : memref<1x16xi32, #tpu.memory_space<vmem>>, vector<1x16xi32>
    %41 = tpu.iota {dimensions = array<i32: 0>} : vector<8x16xi32>
    %42 = vector.broadcast %39 : vector<1x16xi32> to vector<8x16xi32>
    %43 = arith.cmpi eq, %41, %42 : vector<8x16xi32>
    %44 = arith.extui %43 : vector<8x16xi1> to vector<8x16xi32>
    %45 = arith.sitofp %44 : vector<8x16xi32> to vector<8x16xf32>
    %46 = vector.broadcast %40 : vector<1x16xi32> to vector<8x16xi32>
    %47 = arith.cmpi eq, %41, %46 : vector<8x16xi32>
    %48 = arith.extui %47 : vector<8x16xi1> to vector<8x16xi32>
    %49 = arith.sitofp %48 : vector<8x16xi32> to vector<8x16xf32>
    %cst = arith.constant dense<0.000000e+00> : vector<8x8xf32>
    %50 = tpu.matmul %49, %45, %cst {dimension_numbers = #tpu.dot_dimension_numbers<[1], [1], [0], [0], [0, 0, 1, 0], [], []>} : vector<8x16xf32>, vector<8x16xf32>, vector<8x8xf32> -> vector<8x8xf32>
    %cst_81 = arith.constant dense<0.000000e+00> : vector<8x16xf32>
    %51 = tpu.matmul %37, %0, %cst_81 {dimension_numbers = #tpu.dot_dimension_numbers<[1], [0], [0], [1], [0, 0, 1, 1], [], []>} : vector<8x12xf32>, vector<12x16xf32>, vector<8x16xf32> -> vector<8x16xf32>
    %cst_82 = arith.constant dense<0.000000e+00> : vector<8x16xf32>
    %52 = tpu.matmul %37, %2, %cst_82 {dimension_numbers = #tpu.dot_dimension_numbers<[1], [0], [0], [1], [0, 0, 1, 1], [], []>} : vector<8x12xf32>, vector<12x16xf32>, vector<8x16xf32> -> vector<8x16xf32>
    %cst_83 = arith.constant dense<0.000000e+00> : vector<16x16xf32>
    %53 = tpu.matmul %45, %51, %cst_83 {dimension_numbers = #tpu.dot_dimension_numbers<[0], [0], [1], [1], [0, 1, 1, 1], [], []>} : vector<8x16xf32>, vector<8x16xf32>, vector<16x16xf32> -> vector<16x16xf32>
    %cst_84 = arith.constant dense<0.000000e+00> : vector<16x16xf32>
    %54 = tpu.matmul %49, %52, %cst_84 {dimension_numbers = #tpu.dot_dimension_numbers<[0], [0], [1], [1], [0, 1, 1, 1], [], []>} : vector<8x16xf32>, vector<8x16xf32>, vector<16x16xf32> -> vector<16x16xf32>
    %cst_85 = arith.constant dense<0.000000e+00> : vector<16x16xf32>
    %55 = tpu.matmul %38, %1, %cst_85 {dimension_numbers = #tpu.dot_dimension_numbers<[1], [0], [0], [1], [0, 0, 1, 1], [], []>} : vector<16x6xf32>, vector<6x16xf32>, vector<16x16xf32> -> vector<16x16xf32>
    %56 = arith.addf %53, %55 : vector<16x16xf32>
    %57 = arith.addf %56, %54 : vector<16x16xf32>
    %58 = vector.broadcast %3 : vector<1x16xf32> to vector<16x16xf32>
    %59 = arith.addf %57, %58 : vector<16x16xf32>
    %cst_86 = arith.constant 0.000000e+00 : f32
    %60 = vector.broadcast %cst_86 : f32 to vector<16x16xf32>
    %61 = arith.maximumf %59, %60 : vector<16x16xf32>
    %cst_87 = arith.constant dense<0.000000e+00> : vector<16x16xf32>
    %62 = tpu.matmul %61, %4, %cst_87 {dimension_numbers = #tpu.dot_dimension_numbers<[1], [0], [0], [1], [0, 0, 1, 1], [], []>} : vector<16x16xf32>, vector<16x16xf32>, vector<16x16xf32> -> vector<16x16xf32>
    %63 = vector.broadcast %5 : vector<1x16xf32> to vector<16x16xf32>
    %64 = arith.addf %62, %63 : vector<16x16xf32>
    %cst_88 = arith.constant 0.000000e+00 : f32
    %65 = vector.broadcast %cst_88 : f32 to vector<16x16xf32>
    %66 = arith.maximumf %64, %65 : vector<16x16xf32>
    %cst_89 = arith.constant dense<0.000000e+00> : vector<8x16xf32>
    %67 = tpu.matmul %37, %6, %cst_89 {dimension_numbers = #tpu.dot_dimension_numbers<[1], [0], [0], [1], [0, 0, 1, 1], [], []>} : vector<8x12xf32>, vector<12x16xf32>, vector<8x16xf32> -> vector<8x16xf32>
    %cst_90 = arith.constant dense<0.000000e+00> : vector<8x16xf32>
    %68 = tpu.matmul %50, %67, %cst_90 {dimension_numbers = #tpu.dot_dimension_numbers<[1], [0], [0], [1], [0, 0, 1, 1], [], []>} : vector<8x8xf32>, vector<8x16xf32>, vector<8x16xf32> -> vector<8x16xf32>
    %cst_91 = arith.constant dense<0.000000e+00> : vector<8x16xf32>
    %69 = tpu.matmul %49, %66, %cst_91 {dimension_numbers = #tpu.dot_dimension_numbers<[1], [0], [0], [1], [0, 0, 1, 1], [], []>} : vector<8x16xf32>, vector<16x16xf32>, vector<8x16xf32> -> vector<8x16xf32>
    %cst_92 = arith.constant dense<0.000000e+00> : vector<8x16xf32>
    %70 = tpu.matmul %69, %7, %cst_92 {dimension_numbers = #tpu.dot_dimension_numbers<[1], [0], [0], [1], [0, 0, 1, 1], [], []>} : vector<8x16xf32>, vector<16x16xf32>, vector<8x16xf32> -> vector<8x16xf32>
    %71 = arith.addf %68, %70 : vector<8x16xf32>
    %72 = vector.broadcast %8 : vector<1x16xf32> to vector<8x16xf32>
    %73 = arith.addf %71, %72 : vector<8x16xf32>
    %cst_93 = arith.constant 0.000000e+00 : f32
    %74 = vector.broadcast %cst_93 : f32 to vector<8x16xf32>
    %75 = arith.maximumf %73, %74 : vector<8x16xf32>
    %cst_94 = arith.constant dense<0.000000e+00> : vector<8x16xf32>
    %76 = tpu.matmul %75, %9, %cst_94 {dimension_numbers = #tpu.dot_dimension_numbers<[1], [0], [0], [1], [0, 0, 1, 1], [], []>} : vector<8x16xf32>, vector<16x16xf32>, vector<8x16xf32> -> vector<8x16xf32>
    %77 = vector.broadcast %10 : vector<1x16xf32> to vector<8x16xf32>
    %78 = arith.addf %76, %77 : vector<8x16xf32>
    %cst_95 = arith.constant 0.000000e+00 : f32
    %79 = vector.broadcast %cst_95 : f32 to vector<8x16xf32>
    %80 = arith.maximumf %78, %79 : vector<8x16xf32>
    %cst_96 = arith.constant dense<0.000000e+00> : vector<8x16xf32>
    %81 = tpu.matmul %80, %11, %cst_96 {dimension_numbers = #tpu.dot_dimension_numbers<[1], [0], [0], [1], [0, 0, 1, 1], [], []>} : vector<8x16xf32>, vector<16x16xf32>, vector<8x16xf32> -> vector<8x16xf32>
    %cst_97 = arith.constant dense<0.000000e+00> : vector<8x16xf32>
    %82 = tpu.matmul %80, %13, %cst_97 {dimension_numbers = #tpu.dot_dimension_numbers<[1], [0], [0], [1], [0, 0, 1, 1], [], []>} : vector<8x16xf32>, vector<16x16xf32>, vector<8x16xf32> -> vector<8x16xf32>
    %cst_98 = arith.constant dense<0.000000e+00> : vector<16x16xf32>
    %83 = tpu.matmul %45, %81, %cst_98 {dimension_numbers = #tpu.dot_dimension_numbers<[0], [0], [1], [1], [0, 1, 1, 1], [], []>} : vector<8x16xf32>, vector<8x16xf32>, vector<16x16xf32> -> vector<16x16xf32>
    %cst_99 = arith.constant dense<0.000000e+00> : vector<16x16xf32>
    %84 = tpu.matmul %49, %82, %cst_99 {dimension_numbers = #tpu.dot_dimension_numbers<[0], [0], [1], [1], [0, 1, 1, 1], [], []>} : vector<8x16xf32>, vector<8x16xf32>, vector<16x16xf32> -> vector<16x16xf32>
    %cst_100 = arith.constant dense<0.000000e+00> : vector<16x16xf32>
    %85 = tpu.matmul %66, %12, %cst_100 {dimension_numbers = #tpu.dot_dimension_numbers<[1], [0], [0], [1], [0, 0, 1, 1], [], []>} : vector<16x16xf32>, vector<16x16xf32>, vector<16x16xf32> -> vector<16x16xf32>
    %86 = arith.addf %83, %85 : vector<16x16xf32>
    %87 = arith.addf %86, %84 : vector<16x16xf32>
    %88 = vector.broadcast %14 : vector<1x16xf32> to vector<16x16xf32>
    %89 = arith.addf %87, %88 : vector<16x16xf32>
    %cst_101 = arith.constant 0.000000e+00 : f32
    %90 = vector.broadcast %cst_101 : f32 to vector<16x16xf32>
    %91 = arith.maximumf %89, %90 : vector<16x16xf32>
    %cst_102 = arith.constant dense<0.000000e+00> : vector<16x16xf32>
    %92 = tpu.matmul %91, %15, %cst_102 {dimension_numbers = #tpu.dot_dimension_numbers<[1], [0], [0], [1], [0, 0, 1, 1], [], []>} : vector<16x16xf32>, vector<16x16xf32>, vector<16x16xf32> -> vector<16x16xf32>
    %93 = vector.broadcast %16 : vector<1x16xf32> to vector<16x16xf32>
    %94 = arith.addf %92, %93 : vector<16x16xf32>
    %cst_103 = arith.constant 0.000000e+00 : f32
    %95 = vector.broadcast %cst_103 : f32 to vector<16x16xf32>
    %96 = arith.maximumf %94, %95 : vector<16x16xf32>
    %cst_104 = arith.constant dense<0.000000e+00> : vector<8x16xf32>
    %97 = tpu.matmul %80, %17, %cst_104 {dimension_numbers = #tpu.dot_dimension_numbers<[1], [0], [0], [1], [0, 0, 1, 1], [], []>} : vector<8x16xf32>, vector<16x16xf32>, vector<8x16xf32> -> vector<8x16xf32>
    %cst_105 = arith.constant dense<0.000000e+00> : vector<8x16xf32>
    %98 = tpu.matmul %50, %97, %cst_105 {dimension_numbers = #tpu.dot_dimension_numbers<[1], [0], [0], [1], [0, 0, 1, 1], [], []>} : vector<8x8xf32>, vector<8x16xf32>, vector<8x16xf32> -> vector<8x16xf32>
    %cst_106 = arith.constant dense<0.000000e+00> : vector<8x16xf32>
    %99 = tpu.matmul %49, %96, %cst_106 {dimension_numbers = #tpu.dot_dimension_numbers<[1], [0], [0], [1], [0, 0, 1, 1], [], []>} : vector<8x16xf32>, vector<16x16xf32>, vector<8x16xf32> -> vector<8x16xf32>
    %cst_107 = arith.constant dense<0.000000e+00> : vector<8x16xf32>
    %100 = tpu.matmul %99, %18, %cst_107 {dimension_numbers = #tpu.dot_dimension_numbers<[1], [0], [0], [1], [0, 0, 1, 1], [], []>} : vector<8x16xf32>, vector<16x16xf32>, vector<8x16xf32> -> vector<8x16xf32>
    %101 = arith.addf %98, %100 : vector<8x16xf32>
    %102 = vector.broadcast %19 : vector<1x16xf32> to vector<8x16xf32>
    %103 = arith.addf %101, %102 : vector<8x16xf32>
    %cst_108 = arith.constant 0.000000e+00 : f32
    %104 = vector.broadcast %cst_108 : f32 to vector<8x16xf32>
    %105 = arith.maximumf %103, %104 : vector<8x16xf32>
    %cst_109 = arith.constant dense<0.000000e+00> : vector<8x16xf32>
    %106 = tpu.matmul %105, %20, %cst_109 {dimension_numbers = #tpu.dot_dimension_numbers<[1], [0], [0], [1], [0, 0, 1, 1], [], []>} : vector<8x16xf32>, vector<16x16xf32>, vector<8x16xf32> -> vector<8x16xf32>
    %107 = vector.broadcast %21 : vector<1x16xf32> to vector<8x16xf32>
    %108 = arith.addf %106, %107 : vector<8x16xf32>
    %cst_110 = arith.constant 0.000000e+00 : f32
    %109 = vector.broadcast %cst_110 : f32 to vector<8x16xf32>
    %110 = arith.maximumf %108, %109 : vector<8x16xf32>
    %cst_111 = arith.constant dense<0.000000e+00> : vector<8x16xf32>
    %111 = tpu.matmul %110, %22, %cst_111 {dimension_numbers = #tpu.dot_dimension_numbers<[1], [0], [0], [1], [0, 0, 1, 1], [], []>} : vector<8x16xf32>, vector<16x16xf32>, vector<8x16xf32> -> vector<8x16xf32>
    %cst_112 = arith.constant dense<0.000000e+00> : vector<8x16xf32>
    %112 = tpu.matmul %110, %24, %cst_112 {dimension_numbers = #tpu.dot_dimension_numbers<[1], [0], [0], [1], [0, 0, 1, 1], [], []>} : vector<8x16xf32>, vector<16x16xf32>, vector<8x16xf32> -> vector<8x16xf32>
    %cst_113 = arith.constant dense<0.000000e+00> : vector<16x16xf32>
    %113 = tpu.matmul %45, %111, %cst_113 {dimension_numbers = #tpu.dot_dimension_numbers<[0], [0], [1], [1], [0, 1, 1, 1], [], []>} : vector<8x16xf32>, vector<8x16xf32>, vector<16x16xf32> -> vector<16x16xf32>
    %cst_114 = arith.constant dense<0.000000e+00> : vector<16x16xf32>
    %114 = tpu.matmul %49, %112, %cst_114 {dimension_numbers = #tpu.dot_dimension_numbers<[0], [0], [1], [1], [0, 1, 1, 1], [], []>} : vector<8x16xf32>, vector<8x16xf32>, vector<16x16xf32> -> vector<16x16xf32>
    %cst_115 = arith.constant dense<0.000000e+00> : vector<16x16xf32>
    %115 = tpu.matmul %96, %23, %cst_115 {dimension_numbers = #tpu.dot_dimension_numbers<[1], [0], [0], [1], [0, 0, 1, 1], [], []>} : vector<16x16xf32>, vector<16x16xf32>, vector<16x16xf32> -> vector<16x16xf32>
    %116 = arith.addf %113, %115 : vector<16x16xf32>
    %117 = arith.addf %116, %114 : vector<16x16xf32>
    %118 = vector.broadcast %25 : vector<1x16xf32> to vector<16x16xf32>
    %119 = arith.addf %117, %118 : vector<16x16xf32>
    %cst_116 = arith.constant 0.000000e+00 : f32
    %120 = vector.broadcast %cst_116 : f32 to vector<16x16xf32>
    %121 = arith.maximumf %119, %120 : vector<16x16xf32>
    %cst_117 = arith.constant dense<0.000000e+00> : vector<16x16xf32>
    %122 = tpu.matmul %121, %26, %cst_117 {dimension_numbers = #tpu.dot_dimension_numbers<[1], [0], [0], [1], [0, 0, 1, 1], [], []>} : vector<16x16xf32>, vector<16x16xf32>, vector<16x16xf32> -> vector<16x16xf32>
    %123 = vector.broadcast %27 : vector<1x16xf32> to vector<16x16xf32>
    %124 = arith.addf %122, %123 : vector<16x16xf32>
    %cst_118 = arith.constant 0.000000e+00 : f32
    %125 = vector.broadcast %cst_118 : f32 to vector<16x16xf32>
    %126 = arith.maximumf %124, %125 : vector<16x16xf32>
    %cst_119 = arith.constant dense<0.000000e+00> : vector<16x128xf32>
    %127 = tpu.matmul %126, %28, %cst_119 {dimension_numbers = #tpu.dot_dimension_numbers<[1], [0], [0], [1], [0, 0, 1, 1], [], []>} : vector<16x16xf32>, vector<16x128xf32>, vector<16x128xf32> -> vector<16x128xf32>
    %128 = vector.broadcast %29 : vector<1x128xf32> to vector<16x128xf32>
    %129 = arith.addf %127, %128 : vector<16x128xf32>
    %cst_120 = arith.constant dense<0.000000e+00> : vector<8x16xf32>
    %130 = tpu.matmul %110, %30, %cst_120 {dimension_numbers = #tpu.dot_dimension_numbers<[1], [0], [0], [1], [0, 0, 1, 1], [], []>} : vector<8x16xf32>, vector<16x16xf32>, vector<8x16xf32> -> vector<8x16xf32>
    %cst_121 = arith.constant dense<0.000000e+00> : vector<8x16xf32>
    %131 = tpu.matmul %50, %130, %cst_121 {dimension_numbers = #tpu.dot_dimension_numbers<[1], [0], [0], [1], [0, 0, 1, 1], [], []>} : vector<8x8xf32>, vector<8x16xf32>, vector<8x16xf32> -> vector<8x16xf32>
    %cst_122 = arith.constant dense<0.000000e+00> : vector<8x128xf32>
    %132 = tpu.matmul %49, %129, %cst_122 {dimension_numbers = #tpu.dot_dimension_numbers<[1], [0], [0], [1], [0, 0, 1, 1], [], []>} : vector<8x16xf32>, vector<16x128xf32>, vector<8x128xf32> -> vector<8x128xf32>
    %cst_123 = arith.constant dense<0.000000e+00> : vector<8x16xf32>
    %133 = tpu.matmul %132, %31, %cst_123 {dimension_numbers = #tpu.dot_dimension_numbers<[1], [0], [0], [1], [0, 0, 1, 1], [], []>} : vector<8x128xf32>, vector<128x16xf32>, vector<8x16xf32> -> vector<8x16xf32>
    %134 = arith.addf %131, %133 : vector<8x16xf32>
    %135 = vector.broadcast %32 : vector<1x16xf32> to vector<8x16xf32>
    %136 = arith.addf %134, %135 : vector<8x16xf32>
    %cst_124 = arith.constant 0.000000e+00 : f32
    %137 = vector.broadcast %cst_124 : f32 to vector<8x16xf32>
    %138 = arith.maximumf %136, %137 : vector<8x16xf32>
    %cst_125 = arith.constant dense<0.000000e+00> : vector<8x16xf32>
    %139 = tpu.matmul %138, %33, %cst_125 {dimension_numbers = #tpu.dot_dimension_numbers<[1], [0], [0], [1], [0, 0, 1, 1], [], []>} : vector<8x16xf32>, vector<16x16xf32>, vector<8x16xf32> -> vector<8x16xf32>
    %140 = vector.broadcast %34 : vector<1x16xf32> to vector<8x16xf32>
    %141 = arith.addf %139, %140 : vector<8x16xf32>
    %cst_126 = arith.constant 0.000000e+00 : f32
    %142 = vector.broadcast %cst_126 : f32 to vector<8x16xf32>
    %143 = arith.maximumf %141, %142 : vector<8x16xf32>
    %cst_127 = arith.constant dense<0.000000e+00> : vector<8x128xf32>
    %144 = tpu.matmul %143, %35, %cst_127 {dimension_numbers = #tpu.dot_dimension_numbers<[1], [0], [0], [1], [0, 0, 1, 1], [], []>} : vector<8x16xf32>, vector<16x128xf32>, vector<8x128xf32> -> vector<8x128xf32>
    %145 = vector.broadcast %36 : vector<1x128xf32> to vector<8x128xf32>
    %146 = arith.addf %144, %145 : vector<8x128xf32>
    %c0_128 = arith.constant 0 : index
    %c0_129 = arith.constant 0 : index
    %147 = vector.load %arg41[%c0_128, %c0_129] : memref<8x128xf32, #tpu.memory_space<vmem>>, vector<8x128xf32>
    tpu.vector_store %arg41[%c0_128, %c0_129], %146 {strides = array<i32>} : memref<8x128xf32, #tpu.memory_space<vmem>>, vector<8x128xf32>,
    %c0_130 = arith.constant 0 : index
    %c0_131 = arith.constant 0 : index
    %148 = vector.load %arg42[%c0_130, %c0_131] : memref<16x128xf32, #tpu.memory_space<vmem>>, vector<16x128xf32>
    tpu.vector_store %arg42[%c0_130, %c0_131], %129 {strides = array<i32>} : memref<16x128xf32, #tpu.memory_space<vmem>>, vector<16x128xf32>,
    return
  }
}

</mosaic_0001>

<bundles_post_ra>
// kernel: tpu_custom_call.1
= control target key start
LH: loop header
LB: loop body
LE: loop exit
PB: predicated region body
PF: predicated region fallthrough
CT: control target
= control target key end

     0   :  { %s2423_s6 = smov 1   ;;  %s2424_s10 = smov 2   ;;  %s2985_s0 = inlined_call_operand.smem [shape: u32[43], index: -1, kind: input, shape index: {}] }
   0x1   :  { %s2500_s5 = sld [smem:[%s2985_s0]]   ;;  %s2425_s14 = smov 3  }
   0x2   :  { %s2505_s9 = sld [smem:[%s2985_s0 + %s2423_s6]]   ;;  %s2426_s18 = smov 4  }
   0x3   :  { %s2510_s13 = sld [smem:[%s2985_s0 + %s2424_s10]]   ;;  %s2427_s22 = smov 5  }
   0x4   :  { %s2515_s17 = sld [smem:[%s2985_s0 + %s2425_s14]]   ;;  %s2428_s26 = smov 6  }
   0x5   :  { %s2520_s21 = sld [smem:[%s2985_s0 + %s2426_s18]]   ;;  %s2429_s30 = smov 7  }
   0x6   :  { %s2525_s25 = sld [smem:[%s2985_s0 + %s2427_s22]]   ;;  %s2430_s4 = smov 8  }
   0x7   :  { %3006 = sst [smem:[#allocation54_spill]] %s2500_s5  ;;  %s2431_s10 = smov 9  }
   0x8   :  { %s2530_s29 = sld [smem:[%s2985_s0 + %s2428_s26]]   ;;  %s2432_s15 = smov 10  }
   0x9   :  { %s2535_s3 = sld [smem:[%s2985_s0 + %s2429_s30]]   ;;  %s2433_s20 = smov 11  }
   0xa   :  { %3007 = sst [smem:[#allocation55_spill]] %s2515_s17  ;;  %s2434_s26 = smov 12  }
   0xb   :  { %3008 = sst [smem:[#allocation56_spill]] %s2520_s21  ;;  %s2435_s1 = smov 13  }
   0xc   :  { %s2540_s8 = sld [smem:[%s2985_s0 + %s2430_s4]]   ;;  %s2436_s7 = smov 14  }
   0xd   :  { %s2545_s14 = sld [smem:[%s2985_s0 + %s2431_s10]]   ;;  %s2438_s22 = smov 16  }
   0xe   :  { %3009 = sst [smem:[#allocation57_spill]] %s2530_s29  ;;  %s2439_s28 = smov 17  }
   0xf   :  { %s2550_s19 = sld [smem:[%s2985_s0 + %s2432_s15]]   ;;  %s2437_s15 = smov 15  }
  0x10   :  { %s2555_s24 = sld [smem:[%s2985_s0 + %s2433_s20]]  }
  0x11   :  { %s2560_s30 = sld [smem:[%s2985_s0 + %s2434_s26]]  }
  0x12   :  { %3010 = sst [smem:[#allocation58_spill]] %s2540_s8 }
  0x13   :  { %s2565_s6 = sld [smem:[%s2985_s0 + %s2435_s1]]  }
  0x14   :  { %s2570_s12 = sld [smem:[%s2985_s0 + %s2436_s7]]   ;;  %s2440_s7 = smov 18  }
  0x15   :  { %3011 = sst [smem:[#allocation59_spill]] %s2550_s19 }
  0x16   :  { %3012 = sst [smem:[#allocation60_spill]] %s2555_s24 }
  0x17   :  { %s2575_s20 = sld [smem:[%s2985_s0 + %s2437_s15]]   ;;  %s2441_s15 = smov 19  }
  0x18   :  { %s2580_s27 = sld [smem:[%s2985_s0 + %s2438_s22]]   ;;  %s2442_s22 = smov 20  }
  0x19   :  { %3013 = sst [smem:[#allocation61_spill]] %s2565_s6 }
  0x1a   :  { %s2585_s4 = sld [smem:[%s2985_s0 + %s2439_s28]]   ;;  %s2443_s28 = smov 21  }
  0x1b   :  { %s2590_s6 = sld [smem:[%s2985_s0 + %s2440_s7]]   ;;  %s2444_s7 = smov 22  }
  0x1c   :  { %s2610_s24 = sld [smem:[%s2985_s0 + %s2444_s7]]   ;;  %s2448_s7 = smov 26  }
  0x1d   :  { %3014 = sst [smem:[#allocation62_spill]] %s2575_s20 }
  0x1e   :  { %3015 = sst [smem:[#allocation63_spill]] %s2580_s27 }
  0x1f   :  { %s2595_s20 = sld [smem:[%s2985_s0 + %s2441_s15]]   ;;  %s2445_s15 = smov 23  }
  0x20   :  { %3016 = sst [smem:[#allocation64_spill]] %s2585_s4 }
  0x21   :  { %s2600_s27 = sld [smem:[%s2985_s0 + %s2442_s22]]   ;;  %s2446_s22 = smov 24  }
  0x22   :  { %s2605_s4 = sld [smem:[%s2985_s0 + %s2443_s28]]   ;;  %s2447_s28 = smov 25  }
  0x23   :  { %3019 = sst [smem:[#allocation67_spill]] %s2610_s24 }
  0x24   :  { %s2620_s8 = sld [smem:[%s2985_s0 + %s2446_s22]]   ;;  %s2450_s22 = smov 28  }
  0x25   :  { %3017 = sst [smem:[#allocation65_spill]] %s2595_s20 }
  0x26   :  { %s2615_s20 = sld [smem:[%s2985_s0 + %s2445_s15]]   ;;  %s2449_s15 = smov 27  }
  0x27   :  { %3018 = sst [smem:[#allocation66_spill]] %s2600_s27 }
  0x28   :  { %s2625_s17 = sld [smem:[%s2985_s0 + %s2447_s28]]   ;;  %s2451_s28 = smov 29  }
  0x29   :  { %s2630_s19 = sld [smem:[%s2985_s0 + %s2448_s7]]   ;;  %s2452_s7 = smov 30  }
  0x2a   :  { %3020 = sst [smem:[#allocation68_spill]] %s2620_s8 }
  0x2b   :  { %s2635_s5 = sld [smem:[%s2985_s0 + %s2449_s15]]   ;;  %s2453_s15 = smov 31  }
  0x2c   :  { %s2640_s21 = sld [smem:[%s2985_s0 + %s2450_s22]]   ;;  %s2454_s22 = smov 32  }
  0x2d   :  { %s2645_s29 = sld [smem:[%s2985_s0 + %s2451_s28]]   ;;  %s2455_s28 = smov 33  }
  0x2e   :  { %s2660_s8 = sld [smem:[%s2985_s0 + %s2454_s22]]   ;;  %s2458_s22 = smov 36  }
  0x2f   :  { %3021 = sst [smem:[#allocation69_spill]] %s2630_s19 }
  0x30   :  { %s2650_s19 = sld [smem:[%s2985_s0 + %s2452_s7]]   ;;  %s2456_s7 = smov 34  }
  0x31   :  { %3022 = sst [smem:[#allocation70_spill]] %s2635_s5 }
  0x32   :  { %s2655_s5 = sld [smem:[%s2985_s0 + %s2453_s15]]   ;;  %s2457_s15 = smov 35  }
  0x33   :  { %3023 = sst [smem:[#allocation71_spill]] %s2645_s29 }
  0x34   :  { %3025 = sst [smem:[#allocation73_spill]] %s2660_s8 }
  0x35   :  { %s2665_s29 = sld [smem:[%s2985_s0 + %s2455_s28]]   ;;  %s2459_s28 = smov 37  }
  0x36   :  { %s2670_s24 = sld [smem:[%s2985_s0 + %s2456_s7]]   ;;  %s2460_s7 = smov 38  }
  0x37   :  { %s2680_s8 = sld [smem:[%s2985_s0 + %s2458_s22]]   ;;  %s2462_s22 = smov 40  }
  0x38   :  { %3024 = sst [smem:[#allocation72_spill]] %s2655_s5 }
  0x39   :  { %s2675_s5 = sld [smem:[%s2985_s0 + %s2457_s15]]   ;;  %s2461_s15 = smov 39  }
  0x3a   :  { %s2690_s27 = sld [smem:[%s2985_s0 + %s2460_s7]]   ;;  %s2464_s7 = smov 42  }
  0x3b   :  { %3026 = sst [smem:[#allocation74_spill]] %s2665_s29 }
  0x3c   :  { %s2685_s29 = sld [smem:[%s2985_s0 + %s2459_s28]]   ;;  %s2463_s28 = smov 41  }
  0x3d   :  { %3028 = sst [smem:[#allocation76_spill]] %s2680_s8 }
  0x3e   :  { %s2700_s8 = sld [smem:[%s2985_s0 + %s2462_s22]]  }
  0x3f   :  { %3027 = sst [smem:[#allocation75_spill]] %s2675_s5 }
  0x40   :  { %3030 = sst [smem:[#allocation78_spill]] %s2690_s27 }
  0x41   :  { %s2695_s5 = sld [smem:[%s2985_s0 + %s2461_s15]]  }
  0x42   :  { %3029 = sst [smem:[#allocation77_spill]] %s2685_s29 }
  0x43   :  { %s2705_s29 = sld [smem:[%s2985_s0 + %s2463_s28]]  }
  0x44   :  { %s2710_s27 = sld [smem:[%s2985_s0 + %s2464_s7]]  }
  0x45   :  { %91 = vsyncpa [#allocation3], 0 }
  0x46   :  { %92 = vsyncpa [#allocation6], 0 }
  0x47   :  { %93 = vsyncpa [#allocation9], 0 }
  0x48   :  { %94 = vsyncpa [#allocation12], 0 }
  0x49   :  { %95 = vsyncpa [#allocation15], 0 }
  0x4a   :  { %96 = vsyncpa [#allocation18], 0 }
  0x4b   :  { %97 = vsyncpa [#allocation21], 0 }
  0x4c   :  { %98 = vsyncpa [#allocation24], 0 }
  0x4d   :  { %99 = vsyncpa [#allocation27], 0 }
  0x4e   :  { %100 = vsyncpa [#allocation30], 0 }
  0x4f   :  { %101 = vsyncpa [#allocation33], 0 }
  0x50   :  { %102 = vsyncpa [#allocation36], 0 }
  0x51   :  { %103 = vsyncpa [#allocation4], 0  ;;  %s123_s15 = sshll.u32 %s2510_s13, 4  ;;  %s124_s15 = int_to_ptr.hbm [resolvable:$true] %s123_s15 }
  0x52   :  { %104 = vsyncpa [#allocation39], 0  ;;  %s2465_s0 = smov [#allocation5]   ;;  %s151_s18 = sshll.u32 %s2535_s3, 4  ;;  %s152_s18 = int_to_ptr.hbm [resolvable:$true] %s151_s18 }
  0x53   :  { %s125_s16 = sshll.u32 %s2465_s0, 4  ;;  %s1819_s22 = sshra.s32 %s124_s15, 4  ;;  %s126_s16 = int_to_ptr.vmem [resolvable:$true] %s125_s16  ;;  %s1820_s22 = int_to_ptr.hbm [resolvable:$true] %s1819_s22 }
  0x54   :  { %s1821_s23 = scalar_lea.hbm %s1820_s22, 8  ;;  %s1823_s26 = scalar_lea.hbm %s2510_s13, 8 }
  0x55   :  { %p1822_p0 = scmp.ne.s32.totalorder %s1820_s22, %s1821_s23  ;;  %p1824_p1 = scmp.lt.s32.totalorder %s1820_s22, %s2510_s13 }
  0x56   :  { %p1825_p2 = scmp.lt.s32.totalorder %s1823_s26, %s1821_s23 }
  0x58   :  { %p1826_p3 = por %p1825_p2, %p1824_p1 }
  0x5a   :  { %p1827_p4 = pnand %p1826_p3, %p1822_p0 }
  0x5c   :  { %1830 = shalt.err (!%p1827_p4)
}
  0x5d   :  { %128 = dma.hbm_to_vmem [thread:$0]  %s124_s15, 128, %s126_s16, [#allocation6]  }
  0x5e   :  { %s2466_s28 = smov [#allocation8]   ;;  %s179_s2 = sshll.u32 %s2560_s30, 4  ;;  %s180_s2 = int_to_ptr.hbm [resolvable:$true] %s179_s2 }
  0x5f   :  { %s153_s1 = sshll.u32 %s2466_s28, 4  ;;  %s1843_s7 = sshra.s32 %s152_s18, 4  ;;  %s154_s1 = int_to_ptr.vmem [resolvable:$true] %s153_s1  ;;  %s1844_s7 = int_to_ptr.hbm [resolvable:$true] %s1843_s7 }
  0x60   :  { %s1845_s10 = scalar_lea.hbm %s1844_s7, 1  ;;  %s1847_s11 = scalar_lea.hbm %s2535_s3, 1 }
  0x61   :  { %p1846_p5 = scmp.ne.s32.totalorder %s1844_s7, %s1845_s10  ;;  %p1848_p6 = scmp.lt.s32.totalorder %s1844_s7, %s2535_s3 }
  0x62   :  { %p1849_p7 = scmp.lt.s32.totalorder %s1847_s11, %s1845_s10 }
  0x64   :  { %p1850_p8 = por %p1849_p7, %p1848_p6 }
  0x66   :  { %p1851_p9 = pnand %p1850_p8, %p1846_p5 }
  0x68   :  { %1854 = shalt.err (!%p1851_p9)
}
  0x69   :  { %156 = dma.hbm_to_vmem [thread:$0]  %s152_s18, 16, %s154_s1, [#allocation9]  }
  0x6a   :  { %s209_s13 = sshll.u32 %s2590_s6, 4  ;;  %s2467_s15 = smov [#allocation11]   ;;  %s210_s13 = int_to_ptr.hbm [resolvable:$true] %s209_s13 }
  0x6b   :  { %s181_s0 = sshll.u32 %s2467_s15, 4  ;;  %s1867_s16 = sshra.s32 %s180_s2, 4  ;;  %s182_s0 = int_to_ptr.vmem [resolvable:$true] %s181_s0  ;;  %s1868_s16 = int_to_ptr.hbm [resolvable:$true] %s1867_s16 }
  0x6c   :  { %s1869_s22 = scalar_lea.hbm %s1868_s16, 1  ;;  %s1871_s23 = scalar_lea.hbm %s2560_s30, 1 }
  0x6d   :  { %p1870_p10 = scmp.ne.s32.totalorder %s1868_s16, %s1869_s22  ;;  %p1872_p11 = scmp.lt.s32.totalorder %s1868_s16, %s2560_s30 }
  0x6e   :  { %p1873_p12 = scmp.lt.s32.totalorder %s1871_s23, %s1869_s22 }
  0x70   :  { %p1874_p13 = por %p1873_p12, %p1872_p11 }
  0x72   :  { %p1875_p0 = pnand %p1874_p13, %p1870_p10 }
  0x74   :  { %1878 = shalt.err (!%p1875_p0)
}
  0x75   :  { %184 = dma.hbm_to_vmem [thread:$0]  %s180_s2, 16, %s182_s0, [#allocation12]  }
  0x76   :  { %s2468_s3 = smov [#allocation14]   ;;  %s232_s26 = sshll.u32 %s2605_s4, 4  ;;  %s2723_s26 = int_to_ptr.hbm [resolvable:$true] %s232_s26 }
  0x77   :  { %s211_s18 = sshll.u32 %s2468_s3, 4  ;;  %s1891_s28 = sshra.s32 %s210_s13, 4  ;;  %s212_s18 = int_to_ptr.vmem [resolvable:$true] %s211_s18  ;;  %s1892_s28 = int_to_ptr.hbm [resolvable:$true] %s1891_s28 }
  0x78   :  { %s1893_s1 = scalar_lea.hbm %s1892_s28, 1  ;;  %s1895_s7 = scalar_lea.hbm %s2590_s6, 1 }
  0x79   :  { %p1894_p1 = scmp.ne.s32.totalorder %s1892_s28, %s1893_s1  ;;  %p1896_p2 = scmp.lt.s32.totalorder %s1892_s28, %s2590_s6 }
  0x7a   :  { %p1897_p3 = scmp.lt.s32.totalorder %s1895_s7, %s1893_s1 }
  0x7c   :  { %p1898_p4 = por %p1897_p3, %p1896_p2 }
  0x7e   :  { %p1899_p5 = pnand %p1898_p4, %p1894_p1 }
  0x80   :  { %1902 = shalt.err (!%p1899_p5)
}
  0x81   :  { %214 = dma.hbm_to_vmem [thread:$0]  %s210_s13, 16, %s212_s18, [#allocation15]  }
  0x82   :  { %s2469_s30 = smov [#allocation17]   ;;  %s259_s10 = sshll.u32 %s2615_s20, 4  ;;  %s260_s10 = int_to_ptr.hbm [resolvable:$true] %s259_s10 }
  0x83   :  { %s234_s2 = sshll.u32 %s2469_s30, 4  ;;  %s1915_s11 = sshra.s32 %s2723_s26, 4  ;;  %s235_s2 = int_to_ptr.vmem [resolvable:$true] %s234_s2  ;;  %s1916_s11 = int_to_ptr.hbm [resolvable:$true] %s1915_s11 }
  0x84   :  { %s1917_s15 = scalar_lea.hbm %s1916_s11, 16  ;;  %s1919_s0 = scalar_lea.hbm %s2605_s4, 16 }
  0x85   :  { %p1918_p6 = scmp.ne.s32.totalorder %s1916_s11, %s1917_s15  ;;  %p1920_p7 = scmp.lt.s32.totalorder %s1916_s11, %s2605_s4 }
  0x86   :  { %p1921_p8 = scmp.lt.s32.totalorder %s1919_s0, %s1917_s15 }
  0x88   :  { %p1922_p9 = por %p1921_p8, %p1920_p7 }
  0x8a   :  { %p1923_p10 = pnand %p1922_p9, %p1918_p6 }
  0x8c   :  { %1926 = shalt.err (!%p1923_p10)
}
  0x8d   :  { %s2470_s6 = smov 128   ;;  %s2471_s13 = smov 8  }
  0x8e   :  { %240 = dma.hbm_to_vmem [thread:$0]  %s2723_s26, 256, %s235_s2, [#allocation18], %s2470_s6, %s2470_s6, %s2471_s13  }
  0x8f   :  { %s2472_s16 = smov [#allocation20]   ;;  %s283_s23 = sshll.u32 %s2625_s17, 4  ;;  %s284_s23 = int_to_ptr.hbm [resolvable:$true] %s283_s23 }
  0x90   :  { %s261_s22 = sshll.u32 %s2472_s16, 4  ;;  %s1939_s4 = sshra.s32 %s260_s10, 4  ;;  %s262_s22 = int_to_ptr.vmem [resolvable:$true] %s261_s22  ;;  %s1940_s4 = int_to_ptr.hbm [resolvable:$true] %s1939_s4 }
  0x91   :  { %s1941_s3 = scalar_lea.hbm %s1940_s4, 1  ;;  %s1943_s18 = scalar_lea.hbm %s2615_s20, 1 }
  0x92   :  { %p1942_p11 = scmp.ne.s32.totalorder %s1940_s4, %s1941_s3  ;;  %p1944_p12 = scmp.lt.s32.totalorder %s1940_s4, %s2615_s20 }
  0x93   :  { %p1945_p13 = scmp.lt.s32.totalorder %s1943_s18, %s1941_s3 }
  0x95   :  { %p1946_p0 = por %p1945_p13, %p1944_p12 }
  0x97   :  { %p1947_p1 = pnand %p1946_p0, %p1942_p11 }
  0x99   :  { %1950 = shalt.err (!%p1947_p1)
}
  0x9a   :  { %264 = dma.hbm_to_vmem [thread:$0]  %s260_s10, 16, %s262_s22, [#allocation21]  }
  0x9b   :  { %s308_s26 = sshll.u32 %s2640_s21, 4  ;;  %s2473_s28 = smov [#allocation23]   ;;  %s2739_s26 = int_to_ptr.hbm [resolvable:$true] %s308_s26 }
  0x9c   :  { %s285_s1 = sshll.u32 %s2473_s28, 4  ;;  %s1963_s7 = sshra.s32 %s284_s23, 4  ;;  %s286_s1 = int_to_ptr.vmem [resolvable:$true] %s285_s1  ;;  %s1964_s7 = int_to_ptr.hbm [resolvable:$true] %s1963_s7 }
  0x9d   :  { %s1965_s30 = scalar_lea.hbm %s1964_s7, 1  ;;  %s1967_s2 = scalar_lea.hbm %s2625_s17, 1 }
  0x9e   :  { %p1966_p2 = scmp.ne.s32.totalorder %s1964_s7, %s1965_s30  ;;  %p1968_p3 = scmp.lt.s32.totalorder %s1964_s7, %s2625_s17 }
  0x9f   :  { %p1969_p4 = scmp.lt.s32.totalorder %s1967_s2, %s1965_s30 }
  0xa1   :  { %p1970_p5 = por %p1969_p4, %p1968_p3 }
  0xa3   :  { %p1971_p6 = pnand %p1970_p5, %p1966_p2 }
  0xa5   :  { %1974 = shalt.err (!%p1971_p6)
}
  0xa6   :  { %288 = dma.hbm_to_vmem [thread:$0]  %s284_s23, 16, %s286_s1, [#allocation24]  }
  0xa7   :  { %s2474_s20 = smov [#allocation26]   ;;  %s332_s11 = sshll.u32 %s2650_s19, 4  ;;  %s2744_s11 = int_to_ptr.hbm [resolvable:$true] %s332_s11 }
  0xa8   :  { %s310_s10 = sshll.u32 %s2474_s20, 4  ;;  %s1987_s15 = sshra.s32 %s2739_s26, 4  ;;  %s311_s10 = int_to_ptr.vmem [resolvable:$true] %s310_s10  ;;  %s1988_s15 = int_to_ptr.hbm [resolvable:$true] %s1987_s15 }
  0xa9   :  { %s1989_s0 = scalar_lea.hbm %s1988_s15, 16  ;;  %s1991_s17 = scalar_lea.hbm %s2640_s21, 16 }
  0xaa   :  { %p1990_p7 = scmp.ne.s32.totalorder %s1988_s15, %s1989_s0  ;;  %p1992_p8 = scmp.lt.s32.totalorder %s1988_s15, %s2640_s21 }
  0xab   :  { %p1993_p9 = scmp.lt.s32.totalorder %s1991_s17, %s1989_s0 }
  0xad   :  { %p1994_p10 = por %p1993_p9, %p1992_p8 }
  0xaf   :  { %p1995_p11 = pnand %p1994_p10, %p1990_p7 }
  0xb1   :  { %1998 = shalt.err (!%p1995_p11)
}
  0xb2   :  { %316 = dma.hbm_to_vmem [thread:$0]  %s2739_s26, 256, %s311_s10, [#allocation27], %s2470_s6, %s2470_s6, %s2471_s13  }
  0xb3   :  { %s362_s16 = sshll.u32 %s2670_s24, 4  ;;  %s2475_s22 = smov [#allocation29]   ;;  %s2754_s16 = int_to_ptr.hbm [resolvable:$true] %s362_s16 }
  0xb4   :  { %s334_s23 = sshll.u32 %s2475_s22, 4  ;;  %s2011_s21 = sshra.s32 %s2744_s11, 4  ;;  %s335_s23 = int_to_ptr.vmem [resolvable:$true] %s334_s23  ;;  %s2012_s21 = int_to_ptr.hbm [resolvable:$true] %s2011_s21 }
  0xb5   :  { %s2013_s4 = scalar_lea.hbm %s2012_s21, 16  ;;  %s2015_s3 = scalar_lea.hbm %s2650_s19, 16 }
  0xb6   :  { %p2014_p12 = scmp.ne.s32.totalorder %s2012_s21, %s2013_s4  ;;  %p2016_p13 = scmp.lt.s32.totalorder %s2012_s21, %s2650_s19 }
  0xb7   :  { %p2017_p0 = scmp.lt.s32.totalorder %s2015_s3, %s2013_s4 }
  0xb9   :  { %p2018_p1 = por %p2017_p0, %p2016_p13 }
  0xbb   :  { %p2019_p2 = pnand %p2018_p1, %p2014_p12 }
  0xbd   :  { %2022 = shalt.err (!%p2019_p2)
}
  0xbe   :  { %340 = dma.hbm_to_vmem [thread:$0]  %s2744_s11, 256, %s335_s23, [#allocation30], %s2470_s6, %s2470_s6, %s2471_s13  }
  0xbf   :  { %s2476_s18 = smov [#allocation32]   ;;  %s112_s28 = sshll.u32 %s2505_s9, 4  ;;  %s113_s28 = int_to_ptr.hbm [resolvable:$true] %s112_s28 }
  0xc0   :  { %s364_s26 = sshll.u32 %s2476_s18, 4  ;;  %s2035_s1 = sshra.s32 %s2754_s16, 4  ;;  %s365_s26 = int_to_ptr.vmem [resolvable:$true] %s364_s26  ;;  %s2036_s1 = int_to_ptr.hbm [resolvable:$true] %s2035_s1 }
  0xc1   :  { %s2037_s19 = scalar_lea.hbm %s2036_s1, 16  ;;  %s2039_s7 = scalar_lea.hbm %s2670_s24, 16 }
  0xc2   :  { %p2038_p3 = scmp.ne.s32.totalorder %s2036_s1, %s2037_s19  ;;  %p2040_p4 = scmp.lt.s32.totalorder %s2036_s1, %s2670_s24 }
  0xc3   :  { %p2041_p5 = scmp.lt.s32.totalorder %s2039_s7, %s2037_s19 }
  0xc5   :  { %p2042_p6 = por %p2041_p5, %p2040_p4 }
  0xc7   :  { %p2043_p7 = pnand %p2042_p6, %p2038_p3 }
  0xc9   :  { %2046 = shalt.err (!%p2043_p7)
}
  0xca   :  { %370 = dma.hbm_to_vmem [thread:$0]  %s2754_s16, 256, %s365_s26, [#allocation33], %s2470_s6, %s2470_s6, %s2471_s13  }
  0xcb   :  { %s138_s30 = sshll.u32 %s2525_s25, 4  ;;  %s2477_s2 = smov [#allocation2]   ;;  %s139_s30 = int_to_ptr.hbm [resolvable:$true] %s138_s30 }
  0xcc   :  { %s114_s20 = sshll.u32 %s2477_s2, 4  ;;  %s2059_s10 = sshra.s32 %s113_s28, 4  ;;  %s115_s20 = int_to_ptr.vmem [resolvable:$true] %s114_s20  ;;  %s2060_s10 = int_to_ptr.hbm [resolvable:$true] %s2059_s10 }
  0xcd   :  { %s2061_s24 = scalar_lea.hbm %s2060_s10, 1  ;;  %s2063_s11 = scalar_lea.hbm %s2505_s9, 1 }
  0xce   :  { %p2062_p8 = scmp.ne.s32.totalorder %s2060_s10, %s2061_s24  ;;  %p2064_p9 = scmp.lt.s32.totalorder %s2060_s10, %s2505_s9 }
  0xcf   :  { %p2065_p10 = scmp.lt.s32.totalorder %s2063_s11, %s2061_s24 }
  0xd1   :  { %p2066_p11 = por %p2065_p10, %p2064_p9 }
  0xd3   :  { %p2067_p12 = pnand %p2066_p11, %p2062_p8 }
  0xd5   :  { %2070 = shalt.err (!%p2067_p12)
}
  0xd6   :  { %117 = dma.hbm_to_vmem [thread:$0]  %s113_s28, 16, %s115_s20, [#allocation3]  }
  0xd7   :  { %s2478_s15 = smov [#allocation7]   ;;  %s164_s17 = sshll.u32 %s2545_s14, 4  ;;  %s165_s17 = int_to_ptr.hbm [resolvable:$true] %s164_s17 }
  0xd8   :  { %s140_s0 = sshll.u32 %s2478_s15, 4  ;;  %s2083_s16 = sshra.s32 %s139_s30, 4  ;;  %s141_s0 = int_to_ptr.vmem [resolvable:$true] %s140_s0  ;;  %s2084_s16 = int_to_ptr.hbm [resolvable:$true] %s2083_s16 }
  0xd9   :  { %s2085_s22 = scalar_lea.hbm %s2084_s16, 8  ;;  %s2087_s23 = scalar_lea.hbm %s2525_s25, 8 }
  0xda   :  { %p2086_p13 = scmp.ne.s32.totalorder %s2084_s16, %s2085_s22  ;;  %p2088_p0 = scmp.lt.s32.totalorder %s2084_s16, %s2525_s25 }
  0xdb   :  { %p2089_p1 = scmp.lt.s32.totalorder %s2087_s23, %s2085_s22 }
  0xdd   :  { %p2090_p2 = por %p2089_p1, %p2088_p0 }
  0xdf   :  { %p2091_p3 = pnand %p2090_p2, %p2086_p13 }
  0xe1   :  { %2094 = shalt.err (!%p2091_p3)
}
  0xe2   :  { %143 = dma.hbm_to_vmem [thread:$0]  %s139_s30, 128, %s141_s0, [#allocation6]  }
  0xe3   :  { %s192_s9 = sshll.u32 %s2570_s12, 4  ;;  %s2479_s21 = smov [#allocation10]   ;;  %s193_s9 = int_to_ptr.hbm [resolvable:$true] %s192_s9 }
  0xe4   :  { %s166_s4 = sshll.u32 %s2479_s21, 4  ;;  %s2107_s3 = sshra.s32 %s165_s17, 4  ;;  %s167_s4 = int_to_ptr.vmem [resolvable:$true] %s166_s4  ;;  %s2108_s3 = int_to_ptr.hbm [resolvable:$true] %s2107_s3 }
  0xe5   :  { %s2109_s18 = scalar_lea.hbm %s2108_s3, 1  ;;  %s2111_s26 = scalar_lea.hbm %s2545_s14, 1 }
  0xe6   :  { %p2110_p4 = scmp.ne.s32.totalorder %s2108_s3, %s2109_s18  ;;  %p2112_p5 = scmp.lt.s32.totalorder %s2108_s3, %s2545_s14 }
  0xe7   :  { %p2113_p6 = scmp.lt.s32.totalorder %s2111_s26, %s2109_s18 }
  0xe9   :  { %p2114_p7 = por %p2113_p6, %p2112_p5 }
  0xeb   :  { %p2115_p8 = pnand %p2114_p7, %p2110_p4 }
  0xed   :  { %2118 = shalt.err (!%p2115_p8)
}
  0xee   :  { %169 = dma.hbm_to_vmem [thread:$0]  %s165_s17, 16, %s167_s4, [#allocation9]  }
  0xef   :  { %s3031_s25 = sld [smem:[#allocation66_spill]]  ;;  %s2480_s28 = smov [#allocation13]  }
  0xf0   :  { %s194_s1 = sshll.u32 %s2480_s28, 4  ;;  %s2131_s7 = sshra.s32 %s193_s9, 4  ;;  %s195_s1 = int_to_ptr.vmem [resolvable:$true] %s194_s1  ;;  %s2132_s7 = int_to_ptr.hbm [resolvable:$true] %s2131_s7 }
  0xf1   :  { %s2133_s30 = scalar_lea.hbm %s2132_s7, 1  ;;  %s2135_s2 = scalar_lea.hbm %s2570_s12, 1 }
  0xf2   :  { %p2134_p9 = scmp.ne.s32.totalorder %s2132_s7, %s2133_s30  ;;  %p2136_p10 = scmp.lt.s32.totalorder %s2132_s7, %s2570_s12 }
  0xf3   :  { %p2137_p11 = scmp.lt.s32.totalorder %s2135_s2, %s2133_s30 }
  0xf5   :  { %s222_s19 = sshll.u32 %s3031_s25, 4  ;;  %p2138_p12 = por %p2137_p11, %p2136_p10  ;;  %s223_s19 = int_to_ptr.hbm [resolvable:$true] %s222_s19 }
  0xf7   :  { %p2139_p13 = pnand %p2138_p12, %p2134_p9 }
  0xf9   :  { %2142 = shalt.err (!%p2139_p13)
}
  0xfa   :  { %197 = dma.hbm_to_vmem [thread:$0]  %s193_s9, 16, %s195_s1, [#allocation12]  }
  0xfb   :  { %s3032_s14 = sld [smem:[#allocation67_spill]]  ;;  %s2481_s10 = smov [#allocation16]  }
  0xfc   :  { %s224_s24 = sshll.u32 %s2481_s10, 4  ;;  %s2155_s11 = sshra.s32 %s223_s19, 4  ;;  %s225_s24 = int_to_ptr.vmem [resolvable:$true] %s224_s24  ;;  %s2156_s11 = int_to_ptr.hbm [resolvable:$true] %s2155_s11 }
  0xfd   :  { %s2157_s15 = scalar_lea.hbm %s2156_s11, 1  ;;  %s2159_s0 = scalar_lea.hbm %s3031_s25, 1 }
  0xfe   :  { %p2158_p0 = scmp.ne.s32.totalorder %s2156_s11, %s2157_s15  ;;  %p2160_p1 = scmp.lt.s32.totalorder %s2156_s11, %s3031_s25 }
  0xff   :  { %p2161_p2 = scmp.lt.s32.totalorder %s2159_s0, %s2157_s15 }
 0x101   :  { %s245_s20 = sshll.u32 %s3032_s14, 4  ;;  %p2162_p3 = por %p2161_p2, %p2160_p1  ;;  %s2784_s20 = int_to_ptr.hbm [resolvable:$true] %s245_s20 }
 0x103   :  { %p2163_p4 = pnand %p2162_p3, %p2158_p0 }
 0x105   :  { %2166 = shalt.err (!%p2163_p4)
}
 0x106   :  { %227 = dma.hbm_to_vmem [thread:$0]  %s223_s19, 16, %s225_s24, [#allocation15]  }
 0x107   :  { %s3033_s12 = sld [smem:[#allocation68_spill]]  ;;  %s2482_s17 = smov [#allocation19]  }
 0x108   :  { %s247_s16 = sshll.u32 %s2482_s17, 4  ;;  %s2179_s23 = sshra.s32 %s2784_s20, 4  ;;  %s248_s16 = int_to_ptr.vmem [resolvable:$true] %s247_s16  ;;  %s2180_s23 = int_to_ptr.hbm [resolvable:$true] %s2179_s23 }
 0x109   :  { %s2181_s9 = scalar_lea.hbm %s2180_s23, 16  ;;  %s2183_s21 = scalar_lea.hbm %s3032_s14, 16 }
 0x10a   :  { %p2182_p5 = scmp.ne.s32.totalorder %s2180_s23, %s2181_s9  ;;  %p2184_p6 = scmp.lt.s32.totalorder %s2180_s23, %s3032_s14 }
 0x10b   :  { %p2185_p7 = scmp.lt.s32.totalorder %s2183_s21, %s2181_s9 }
 0x10d   :  { %s269_s22 = sshll.u32 %s3033_s12, 4  ;;  %p2186_p8 = por %p2185_p7, %p2184_p6  ;;  %s2789_s22 = int_to_ptr.hbm [resolvable:$true] %s269_s22 }
 0x10f   :  { %p2187_p9 = pnand %p2186_p8, %p2182_p5 }
 0x111   :  { %2190 = shalt.err (!%p2187_p9)
}
 0x112   :  { %s3034_s4 = sld [smem:[#allocation69_spill]]  ;;  %s2483_s18 = smov [#allocation22]  }
 0x113   :  { %253 = dma.hbm_to_vmem [thread:$0]  %s2784_s20, 256, %s248_s16, [#allocation18], %s2470_s6, %s2470_s6, %s2471_s13  }
 0x114   :  { %s271_s26 = sshll.u32 %s2483_s18, 4  ;;  %s2203_s25 = sshra.s32 %s2789_s22, 4  ;;  %s272_s26 = int_to_ptr.vmem [resolvable:$true] %s271_s26  ;;  %s2204_s25 = int_to_ptr.hbm [resolvable:$true] %s2203_s25 }
 0x115   :  { %s2205_s28 = scalar_lea.hbm %s2204_s25, 16  ;;  %s2207_s1 = scalar_lea.hbm %s3033_s12, 16 }
 0x116   :  { %p2206_p10 = scmp.ne.s32.totalorder %s2204_s25, %s2205_s28  ;;  %p2208_p11 = scmp.lt.s32.totalorder %s2204_s25, %s3033_s12 }
 0x117   :  { %p2209_p12 = scmp.lt.s32.totalorder %s2207_s1, %s2205_s28 }
 0x118   :  { %s293_s3 = sshll.u32 %s3034_s4, 4  ;;  %s2799_s3 = int_to_ptr.hbm [resolvable:$true] %s293_s3 }
 0x119   :  { %p2210_p13 = por %p2209_p12, %p2208_p11 }
 0x11b   :  { %p2211_p0 = pnand %p2210_p13, %p2206_p10 }
 0x11d   :  { %2214 = shalt.err (!%p2211_p0)
}
 0x11e   :  { %s3035_s19 = sld [smem:[#allocation71_spill]]  ;;  %s2484_s7 = smov [#allocation25]  }
 0x11f   :  { %277 = dma.hbm_to_vmem [thread:$0]  %s2789_s22, 256, %s272_s26, [#allocation21], %s2470_s6, %s2470_s6, %s2471_s13  }
 0x120   :  { %s295_s30 = sshll.u32 %s2484_s7, 4  ;;  %s2227_s14 = sshra.s32 %s2799_s3, 4  ;;  %s296_s30 = int_to_ptr.vmem [resolvable:$true] %s295_s30  ;;  %s2228_s14 = int_to_ptr.hbm [resolvable:$true] %s2227_s14 }
 0x121   :  { %s2229_s20 = scalar_lea.hbm %s2228_s14, 16  ;;  %s2231_s10 = scalar_lea.hbm %s3034_s4, 16 }
 0x122   :  { %p2230_p1 = scmp.ne.s32.totalorder %s2228_s14, %s2229_s20  ;;  %p2232_p2 = scmp.lt.s32.totalorder %s2228_s14, %s3034_s4 }
 0x123   :  { %p2233_p3 = scmp.lt.s32.totalorder %s2231_s10, %s2229_s20 }
 0x124   :  { %s322_s2 = sshll.u32 %s3035_s19, 4  ;;  %s323_s2 = int_to_ptr.hbm [resolvable:$true] %s322_s2 }
 0x125   :  { %p2234_p4 = por %p2233_p3, %p2232_p2 }
 0x127   :  { %p2235_p5 = pnand %p2234_p4, %p2230_p1 }
 0x129   :  { %2238 = shalt.err (!%p2235_p5)
}
 0x12a   :  { %s3036_s24 = sld [smem:[#allocation73_spill]]  ;;  %s2485_s15 = smov [#allocation28]  }
 0x12b   :  { %301 = dma.hbm_to_vmem [thread:$0]  %s2799_s3, 256, %s296_s30, [#allocation24], %s2470_s6, %s2470_s6, %s2471_s13  }
 0x12c   :  { %s324_s0 = sshll.u32 %s2485_s15, 4  ;;  %s2251_s12 = sshra.s32 %s323_s2, 4  ;;  %s325_s0 = int_to_ptr.vmem [resolvable:$true] %s324_s0  ;;  %s2252_s12 = int_to_ptr.hbm [resolvable:$true] %s2251_s12 }
 0x12d   :  { %s2253_s17 = scalar_lea.hbm %s2252_s12, 1  ;;  %s2255_s16 = scalar_lea.hbm %s3035_s19, 1 }
 0x12e   :  { %p2254_p6 = scmp.ne.s32.totalorder %s2252_s12, %s2253_s17  ;;  %p2256_p7 = scmp.lt.s32.totalorder %s2252_s12, %s3035_s19 }
 0x12f   :  { %p2257_p8 = scmp.lt.s32.totalorder %s2255_s16, %s2253_s17 }
 0x130   :  { %s347_s11 = sshll.u32 %s3036_s24, 4  ;;  %s2817_s11 = int_to_ptr.hbm [resolvable:$true] %s347_s11 }
 0x131   :  { %p2258_p9 = por %p2257_p8, %p2256_p7 }
 0x133   :  { %p2259_p10 = pnand %p2258_p9, %p2254_p6 }
 0x135   :  { %2262 = shalt.err (!%p2259_p10)
}
 0x136   :  { %327 = dma.hbm_to_vmem [thread:$0]  %s323_s2, 16, %s325_s0, [#allocation27]  }
 0x137   :  { %s3037_s22 = sld [smem:[#allocation77_spill]]  ;;  %s2486_s23 = smov [#allocation31]  }
 0x138   :  { %s349_s9 = sshll.u32 %s2486_s23, 4  ;;  %s2275_s4 = sshra.s32 %s2817_s11, 4  ;;  %s350_s9 = int_to_ptr.vmem [resolvable:$true] %s349_s9  ;;  %s2276_s4 = int_to_ptr.hbm [resolvable:$true] %s2275_s4 }
 0x139   :  { %s2277_s3 = scalar_lea.hbm %s2276_s4, 16  ;;  %s2279_s18 = scalar_lea.hbm %s3036_s24, 16 }
 0x13a   :  { %p2278_p11 = scmp.ne.s32.totalorder %s2276_s4, %s2277_s3  ;;  %p2280_p12 = scmp.lt.s32.totalorder %s2276_s4, %s3036_s24 }
 0x13b   :  { %p2281_p13 = scmp.lt.s32.totalorder %s2279_s18, %s2277_s3 }
 0x13d   :  { %s379_s21 = sshll.u32 %s3037_s22, 4  ;;  %p2282_p0 = por %p2281_p13, %p2280_p12  ;;  %s2822_s21 = int_to_ptr.hbm [resolvable:$true] %s379_s21 }
 0x13f   :  { %p2283_p1 = pnand %p2282_p0, %p2278_p11 }
 0x141   :  { %2286 = shalt.err (!%p2283_p1)
}
 0x142   :  { %355 = dma.hbm_to_vmem [thread:$0]  %s2817_s11, 256, %s350_s9, [#allocation30], %s2470_s6, %s2470_s6, %s2471_s13  }
 0x143   :  { %s394_s26 = sshll.u32 %s2695_s5, 4  ;;  %s2487_s25 = smov [#allocation34]   ;;  %s2832_s26 = int_to_ptr.hbm [resolvable:$true] %s394_s26 }
 0x144   :  { %s381_s28 = sshll.u32 %s2487_s25, 4  ;;  %s2299_s1 = sshra.s32 %s2822_s21, 4  ;;  %s382_s28 = int_to_ptr.vmem [resolvable:$true] %s381_s28  ;;  %s2300_s1 = int_to_ptr.hbm [resolvable:$true] %s2299_s1 }
 0x145   :  { %s2301_s19 = scalar_lea.hbm %s2300_s1, 16  ;;  %s2303_s7 = scalar_lea.hbm %s3037_s22, 16 }
 0x146   :  { %p2302_p2 = scmp.ne.s32.totalorder %s2300_s1, %s2301_s19  ;;  %p2304_p3 = scmp.lt.s32.totalorder %s2300_s1, %s3037_s22 }
 0x147   :  { %p2305_p4 = scmp.lt.s32.totalorder %s2303_s7, %s2301_s19 }
 0x149   :  { %p2306_p5 = por %p2305_p4, %p2304_p3 }
 0x14b   :  { %p2307_p6 = pnand %p2306_p5, %p2302_p2 }
 0x14d   :  { %2310 = shalt.err (!%p2307_p6)
}
 0x14e   :  { %387 = dma.hbm_to_vmem [thread:$0]  %s2822_s21, 256, %s382_s28, [#allocation33], %s2470_s6, %s2470_s6, %s2471_s13  }
 0x14f   :  { %s2488_s30 = smov [#allocation35]   ;;  %s2323_s14 = sshra.s32 %s2832_s26, 4  ;;  %s2324_s14 = int_to_ptr.hbm [resolvable:$true] %s2323_s14 }
 0x150   :  { %s396_s2 = sshll.u32 %s2488_s30, 4  ;;  %s2325_s20 = scalar_lea.hbm %s2324_s14, 16  ;;  %s397_s2 = int_to_ptr.vmem [resolvable:$true] %s396_s2 }
 0x151   :  { %p2326_p7 = scmp.ne.s32.totalorder %s2324_s14, %s2325_s20  ;;  %s2327_s10 = scalar_lea.hbm %s2695_s5, 16 }
 0x152   :  { %p2328_p8 = scmp.lt.s32.totalorder %s2324_s14, %s2695_s5  ;;  %p2329_p9 = scmp.lt.s32.totalorder %s2327_s10, %s2325_s20 }
 0x154   :  { %p2330_p10 = por %p2329_p9, %p2328_p8 }
 0x156   :  { %p2331_p11 = pnand %p2330_p10, %p2326_p7 }
 0x158   :  { %2334 = shalt.err (!%p2331_p11)
}
 0x159   :  { %402 = dma.hbm_to_vmem [thread:$0]  %s2832_s26, 256, %s397_s2, [#allocation36], %s2470_s6, %s2470_s6, %s2471_s13  }
 0x15a   :  { %2395 = dma.done.wait [#allocation3], 16  }
 0x15b   :  { %2396 = vsyncadd [#allocation3], 4294967280 }
 0x15c   :  { %2397 = dma.done.wait [#allocation6], 256  }
 0x15d   :  { %2398 = vsyncadd [#allocation6], 4294967040 }
 0x15e   :  { %2399 = dma.done.wait [#allocation9], 32  }
 0x15f   :  { %2400 = vsyncadd [#allocation9], 4294967264 }
 0x160   :  { %2401 = dma.done.wait [#allocation12], 32  }
 0x161   :  { %2402 = vsyncadd [#allocation12], 4294967264 }
 0x162   :  { %2403 = dma.done.wait [#allocation15], 32  }
 0x163   :  { %2404 = vsyncadd [#allocation15], 4294967264 }
 0x164   :  { %2405 = dma.done.wait [#allocation18], 512  }
 0x165   :  { %2406 = vsyncadd [#allocation18], 4294966784 }
 0x166   :  { %2407 = dma.done.wait [#allocation21], 272  }
 0x167   :  { %2408 = vsyncadd [#allocation21], 4294967024 }
 0x168   :  { %2409 = dma.done.wait [#allocation24], 272  }
 0x169   :  { %2410 = vsyncadd [#allocation24], 4294967024 }
 0x16a   :  { %2411 = dma.done.wait [#allocation27], 272  }
 0x16b   :  { %2412 = vsyncadd [#allocation27], 4294967024 }
 0x16c   :  { %2413 = dma.done.wait [#allocation30], 512  }
 0x16d   :  { %2414 = vsyncadd [#allocation30], 4294966784 }
 0x16e   :  { %2415 = dma.done.wait [#allocation33], 512  }
 0x16f   :  { %2416 = vsyncadd [#allocation33], 4294966784 }
 0x170   :  { %2417 = dma.done.wait [#allocation36], 256  }
 0x171   :  { %2418 = vsyncadd [#allocation36], 4294967040  ;;  %s3038_s5 = sld [smem:[#allocation57_spill]]  ;;  %v571_v0 = vlaneseq  ;;  %vm612_vm0 = vcmask 1043456   ;;  %v1803_v2 = vld [vmem:[#allocation2] ss:$0 sm:$0xff] }
 0x172   :  { %s3039_s24 = sld [smem:[#allocation56_spill]]  ;;  %v566_v5 = vld [vmem:[#allocation5] sm:$0xff]  ;;  %vm608_vm2 = vcmask 97280   ;;  %v2489_v8 = vmov 0.0   ;;  %vm581_vm4 = vcmask 130048   ;;  %vm728_vm5 = vcmask 1045504  }
 0x173   :  { %v572_v1 = vshrl.u32 %v571_v0, 7  ;;  %s3040_s11 = sld [smem:[#allocation54_spill]]  ;;  %v495_v15 = vld [vmem:[#allocation7] sm:$0x3f]  ;;  %vm721_vm6 = vcmask 48128   ;;  %vm691_vm7 = vcmask 64512  }
 0x174   :  { %s3041_s15 = sld [smem:[#allocation59_spill]]  ;;  %v1805_v31 = vld [vmem:[#allocation8] ss:$0 sm:$0xff]  ;;  %v1806_v44 = vld [vmem:[#allocation10] ss:$0 sm:$0xff]  ;;  %s2490_s1 = smov [#allocation38]  }
 0x175   :  { %vm578_vm1 = vcmp.eq.s32.totalorder %v572_v1, %v1803_v2  ;;  %s3042_s0 = sld [smem:[#allocation55_spill]]  ;;  %v1807_v56 = vld [vmem:[#allocation11] ss:$0 sm:$0xff]  ;;  %v1808_v2 = vld [vmem:[#allocation13] ss:$0 sm:$0xff]  ;;  %s1605_s19 = sshll.u32 %s2490_s1, 4  ;;  %s1606_s19 = int_to_ptr.vmem [resolvable:$true] %s1605_s19 }
 0x176   :  { %v2853_v9 = vsel %vm578_vm1, 1.0, %v2489_v8  ;;  %s3043_s12 = sld [smem:[#allocation58_spill]]  ;;  %s1607_s7 = sshll.u32 %s2710_s27, 4  ;;  %s1608_s7 = int_to_ptr.hbm [resolvable:$true] %s1607_s7 }
 0x177   :  { %v497_v3 = vld [vmem:[%s3038_s5 + $0x8] sm:$0xf]  ;;  %v496_v4 = vld [vmem:[%s3038_s5] sm:$0xff]  ;;  %659 = vxpose.xlu0.b32.start.end [1/1] (short) (narrow) %v2853_v9, 16  ;;  %s3044_s17 = sld [smem:[#allocation60_spill]]  ;;  %s2359_s30 = sshra.s32 %s1608_s7, 4  ;;  %s2360_s30 = int_to_ptr.hbm [resolvable:$true] %s2359_s30 }
 0x178   :  { %1684 = vmatpush.msk.msra.mxu2 %vm612_vm0, %v497_v3  ;;  %v494_v6 = vld [vmem:[%s3039_s24 + $0x8] sm:$0xf]  ;;  %v493_v7 = vld [vmem:[%s3039_s24] sm:$0xff]  ;;  %s3045_s16 = sld [smem:[#allocation61_spill]]  ;;  %s2361_s2 = scalar_lea.hbm %s2360_s30, 16 }
 0x179   :  { %1682 = vmatpush.msk.msra.mxu1 %vm612_vm0, %v494_v6  ;;  %v1804_v10 = vld [vmem:[%s3040_s11] ss:$0 sm:$0xff]  ;;  %s3046_s22 = sld [smem:[#allocation63_spill]]  ;;  %p2362_p12 = scmp.ne.s32.totalorder %s2360_s30, %s2361_s2 }
 0x17a   :  { %654 = vmatpush.msra.mxu2 %v496_v4  ;;  %vm574_vm3 = vcmp.eq.s32.totalorder %v572_v1, %v1804_v10  ;;  %v503_v13 = vld [vmem:[%s3041_s15 + $0x8] sm:$0xf]  ;;  %v502_v16 = vld [vmem:[%s3041_s15] sm:$0xff]  ;;  %s3047_s23 = sld [smem:[#allocation62_spill]]  ;;  %s2363_s14 = scalar_lea.hbm %s2710_s27, 16 }
 0x17b   :  { %1685 = vmatmul.msk.f32.vlgmr.msra.gmra.mxu2 %vm608_vm2, %v566_v5  ;;  %631 = vmatpush.msra.mxu1 %v493_v7  ;;  %v1678_v11 = vsel %vm574_vm3, 1.0, %v2489_v8  ;;  %v567_v17 = vld [vmem:[%s3042_s0] sm:$0xff]  ;;  %v568_v18 = vld [vmem:[%s3042_s0 + $0x8] sm:$0xff]  ;;  %s3048_s9 = sld [smem:[#allocation64_spill]]  ;;  %p2364_p13 = scmp.lt.s32.totalorder %s2360_s30, %s2710_s27 }
 0x17c   :  { %1683 = vmatmul.msk.f32.vlgmr.msra.gmra.mxu1 %vm608_vm2, %v566_v5  ;;  %1680 = vmatpush.xpose.msk.msra.mxu0 %vm581_vm4, %v1678_v11  ;;  %v500_v23 = vld [vmem:[%s3043_s12 + $0x8] sm:$0xff]  ;;  %v499_v24 = vld [vmem:[%s3043_s12] sm:$0xff]  ;;  %s3049_s21 = sld [smem:[#allocation65_spill]]  ;;  %p2365_p0 = scmp.lt.s32.totalorder %s2363_s14, %s2361_s2 }
 0x17d   :  { %848 = vmatpush.msrb.mxu2 %v500_v23  ;;  %v505_v42 = vld [vmem:[%s3044_s17 + $0x8] sm:$0xff]  ;;  %v504_v50 = vld [vmem:[%s3044_s17] sm:$0xff]  ;;  %s3050_s4 = sld [smem:[#allocation70_spill]] }
 0x17e   :  { %v508_v52 = vld [vmem:[%s3045_s16 + $0x8] sm:$0xff]  ;;  %v507_v53 = vld [vmem:[%s3045_s16] sm:$0xff]  ;;  %s3051_s3 = sld [smem:[#allocation72_spill]]  ;;  %p2366_p1 = por %p2365_p0, %p2364_p13 }
 0x17f   :  { %1681 = vmatmul.msk.f32.vlgmr.msra.gmra.mxu0 %vm581_vm4, %v2853_v9  ;;  %849 = vmatpush.msrb.mxu2 %v499_v24  ;;  %v513_v54 = vld [vmem:[%s3046_s22 + $0x8] sm:$0xff]  ;;  %v512_v55 = vld [vmem:[%s3046_s22] sm:$0xff]  ;;  %s3052_s18 = sld [smem:[#allocation75_spill]] }
 0x180   :  { %1688 = vmatpush.msk.msrb.mxu0 %vm728_vm5, %v495_v15  ;;  %v511_v62 = vld [vmem:[%s3047_s23 + $0x8] sm:$0xff]  ;;  %v510_v0 = vld [vmem:[%s3047_s23] sm:$0xff]  ;;  %s3053_s26 = sld [smem:[#allocation74_spill]]  ;;  %p2367_p2 = pnand %p2366_p1, %p2362_p12 }
 0x181   :  { %973 = vmatpush.msra.mxu2 %v508_v52  ;;  %v515_v63 = vld [vmem:[%s3048_s9 + $0x8] sm:$0xff]  ;;  %v514_v1 = vld [vmem:[%s3048_s9] sm:$0xff]  ;;  %s3054_s25 = sld [smem:[#allocation76_spill]] }
 0x182   :  { %919 = vmatpush.msra.mxu0 %v505_v42  ;;  %v521_v7 = vld [vmem:[#allocation17 + $0x8] sm:$0xff]  ;;  %v520_v8 = vld [vmem:[#allocation17] sm:$0xff]  ;;  %v522_v42 = vld [vmem:[#allocation19] sm:$0xff]  ;;  %s3055_s28 = sld [smem:[#allocation78_spill]] }
 0x183   :  { %974 = vmatpush.msra.mxu2 %v507_v53 }
 0x184   :  { %920 = vmatpush.msra.mxu0 %v504_v50 }
 0x187   :  { %755 = vxpose.xlu0.b32.start.end [1/1] (short) (narrow) %v1678_v11, 16  ;;  %1689 = vmatmul.msk.f32.vlgmr.msrb.gmra.mxu0 %vm721_vm6, %v567_v17  ;;  %v518_v11 = vld [vmem:[%s3049_s21 + $0x8] sm:$0xff] }
 0x188   :  { %1017 = vmatpush.msrb.mxu0 %v515_v63 }
 0x18a   :  { %1018 = vmatpush.msrb.mxu0 %v514_v1 }
 0x18f   :  { %1690 = vmatmul.msk.f32.gmra.mxu0 %vm721_vm6, %v568_v18  ;;  %v1809_v18 = vld [vmem:[#allocation14] ss:$0 sm:$0xff] }
 0x1f9   :  { %v633_v14 = vpop.f32.mrf.mxu1 }
 0x1fc   :  { %v2887_v25 = vpop.f32.mrf.mxu0 }
 0x1fe   :  { %v656_v12 = vpop.f32.mrf.mxu2 }
 0x1ff   :  { %713 = vmatpush.msrb.mxu1 %v656_v12  ;;  %1733 = vmatpush.msra.mxu3 %v656_v12  ;;  %v517_v12 = vld [vmem:[%s3049_s21] sm:$0xff] }
 0x201   :  { %1695 = vmatpush.msk.msrb.mxu3 %vm612_vm0, %v503_v13  ;;  %808 = vmatpush.msra.mxu1 %v633_v14 }
 0x203   :  { %877 = vmatpush.msrb.mxu3 %v502_v16 }
 0x204   :  { %v749_v27 = vpop.f32.mrf.mxu0 }
 0x20c   :  { %v752_v35 = vpop.f32.mrf.mxu0 }
 0x21b   :  { %v2868_v19 = vpop.trf.xlu0 }
 0x21c   :  { %1686 = vmatmul.msk.f32.vlgmr.msrb.gmra.mxu1 %vm691_vm7, %v2868_v19 }
 0x223   :  { %v2872_v20 = vpop.trf.xlu0 }
 0x224   :  { %1687 = vmatmul.msk.f32.vlgmr.msra.gmra.mxu3 %vm691_vm7, %v2872_v20 }
 0x22b   :  { %v2876_v21 = vpop.trf.xlu0 }
 0x22c   :  { %1691 = vmatmul.msk.f32.vlgmr.msra.gmra.mxu1 %vm691_vm7, %v2876_v21  ;;  %1696 = vmatmul.msk.f32.vlgmr.msrb.gmra.mxu3 %vm608_vm2, %v566_v5 }
 0x233   :  { %v2881_v22 = vpop.trf.xlu0 }
 0x234   :  { %1692 = vmatmul.msk.f32.gmra.mxu1 %vm691_vm7, %v2881_v22 }
 0x299   :  { %v715_v26 = vpop.f32.mrf.mxu1 }
 0x2a7   :  { %v718_v28 = vpop.f32.mrf.mxu3 }
 0x2a9   :  { %v810_v29 = vpop.f32.mrf.mxu1 }
 0x2aa   :  { %v811_v30 = vadd.f32 %v810_v29, %v749_v27 }
 0x2ac   :  { %v816_v32 = vadd.f32 %v811_v30, %v715_v26 }
 0x2ae   :  { %v821_v33 = vadd.f32 %v1805_v31, %v816_v32 }
 0x2af   :  { %v879_v34 = vpop.f32.mrf.mxu3 }
 0x2b0   :  { %v823_v36 = vmax.f32 %v821_v33, 0.0  ;;  %943 = vmatpush.msrb.mxu1 %v879_v34  ;;  %v523_v34 = vld [vmem:[#allocation19 + $0x8] sm:$0xff] }
 0x2b1   :  { %v813_v37 = vpop.f32.mrf.mxu1  ;;  %1699 = vmatmul.msk.f32.vlgmr.msrb.gmra.mxu1 %vm691_vm7, %v2887_v25 }
 0x2b2   :  { %v814_v38 = vadd.f32 %v813_v37, %v752_v35  ;;  %1693 = vmatmul.msk.f32.vlgmr.msrb.gmra.mxu2 %vm581_vm4, %v823_v36  ;;  %v1810_v36 = vld [vmem:[#allocation16] ss:$0 sm:$0xff] }
 0x2b3   :  { %1066 = vmatpush.msrb.mxu2 %v513_v54  ;;  %v529_v54 = vld [vmem:[#allocation25 + $0x8] sm:$0xff] }
 0x2b4   :  { %v817_v39 = vadd.f32 %v814_v38, %v718_v28 }
 0x2b5   :  { %1067 = vmatpush.msrb.mxu2 %v512_v55  ;;  %v533_v55 = vld [vmem:[#allocation26 + $0x8] sm:$0xff] }
 0x2b6   :  { %v822_v40 = vadd.f32 %v1805_v31, %v817_v39 }
 0x2b8   :  { %v824_v41 = vmax.f32 %v822_v40, 0.0 }
 0x2ba   :  { %1694 = vmatmul.msk.f32.gmra.mxu2 %vm581_vm4, %v824_v41 }
 0x32e   :  { %v945_v57 = vpop.f32.mrf.mxu1 }
 0x335   :  { %v851_v43 = vpop.f32.mrf.mxu2 }
 0x336   :  { %v852_v46 = vadd.f32 %v1806_v44, %v851_v43 }
 0x338   :  { %v857_v49 = vmax.f32 %v852_v46, 0.0  ;;  %v531_v46 = vld [vmem:[%s3050_s4 + $0x8] sm:$0xff] }
 0x33d   :  { %v854_v45 = vpop.f32.mrf.mxu2 }
 0x33e   :  { %v855_v47 = vadd.f32 %v1806_v44, %v854_v45  ;;  %v526_v44 = vld [vmem:[#allocation22 + $0x8] sm:$0xff]  ;;  %v525_v45 = vld [vmem:[#allocation22] sm:$0xff] }
 0x340   :  { %v858_v48 = vmax.f32 %v855_v47, 0.0  ;;  %v530_v47 = vld [vmem:[%s3050_s4] sm:$0xff] }
 0x342   :  { %896 = vmatpush.msra.mxu3 %v858_v48 }
 0x344   :  { %897 = vmatpush.msra.mxu3 %v857_v49 }
 0x345   :  { %1697 = vmatmul.msk.f32.vlgmr.msra.gmra.mxu3 %vm581_vm4, %v2853_v9 }
 0x346   :  { %997 = vmatpush.msrb.mxu3 %v511_v62 }
 0x348   :  { %998 = vmatpush.msrb.mxu3 %v510_v0 }
 0x3c8   :  { %v899_v51 = vpop.f32.mrf.mxu3 }
 0x3c9   :  { %1698 = vmatmul.msk.f32.vlgmr.msra.gmra.mxu0 %vm581_vm4, %v899_v51 }
 0x3ca   :  { %1130 = vmatpush.msra.mxu0 %v518_v11 }
 0x3cc   :  { %1131 = vmatpush.msra.mxu0 %v517_v12 }
 0x446   :  { %v922_v58 = vpop.f32.mrf.mxu0 }
 0x447   :  { %v946_v59 = vadd.f32 %v945_v57, %v922_v58  ;;  %v528_v57 = vld [vmem:[#allocation25] sm:$0xff]  ;;  %v532_v58 = vld [vmem:[#allocation26] sm:$0xff] }
 0x449   :  { %v951_v60 = vadd.f32 %v1807_v56, %v946_v59  ;;  %v542_v56 = vld [vmem:[#allocation32 + $0x8] sm:$0xff]  ;;  %v541_v59 = vld [vmem:[#allocation32] sm:$0xff] }
 0x44b   :  { %v952_v61 = vmax.f32 %v951_v60, 0.0  ;;  %v1812_v60 = vld [vmem:[#allocation23] ss:$0 sm:$0xff] }
 0x44d   :  { %1700 = vmatmul.msk.f32.vlgmr.msra.gmra.mxu2 %vm581_vm4, %v952_v61 }
 0x455   :  { %1705 = vmatmul.msk.f32.vlgmr.msrb.gmra.mxu2 %vm581_vm4, %v857_v49 }
 0x45d   :  { %1706 = vmatmul.msk.f32.gmra.mxu2 %vm581_vm4, %v858_v48  ;;  %v1811_v48 = vld [vmem:[#allocation20] ss:$0 sm:$0xff] }
 0x4d0   :  { %v976_v3 = vpop.f32.mrf.mxu2 }
 0x4d1   :  { %v977_v4 = vadd.f32 %v1808_v2, %v976_v3 }
 0x4d3   :  { %v979_v5 = vmax.f32 %v977_v4, 0.0 }
 0x4d5   :  { %1701 = vmatmul.msk.f32.vlgmr.msrb.gmra.mxu3 %vm581_vm4, %v979_v5  ;;  %1702 = vmatmul.msk.f32.vlgmr.msrb.gmra.mxu0 %vm581_vm4, %v979_v5 }
 0x4d8   :  { %v1069_v15 = vpop.f32.mrf.mxu2 }
 0x4e0   :  { %v1072_v28 = vpop.f32.mrf.mxu2 }
 0x552   :  { %v1020_v6 = vpop.f32.mrf.mxu0 }
 0x553   :  { %1038 = vmatpush.msra.mxu1 %v1020_v6  ;;  %v535_v6 = vld [vmem:[#allocation29] sm:$0xff] }
 0x554   :  { %1703 = vmatmul.msk.f32.vlgmr.msra.gmra.mxu1 %vm691_vm7, %v2868_v19 }
 0x555   :  { %1155 = vmatpush.msrb.mxu1 %v521_v7 }
 0x557   :  { %1156 = vmatpush.msrb.mxu1 %v520_v8 }
 0x558   :  { %v1000_v10 = vpop.f32.mrf.mxu3 }
 0x559   :  { %1090 = vmatpush.msra.mxu3 %v1000_v10  ;;  %1249 = vmatpush.msra.mxu1 %v526_v44  ;;  %v1813_v10 = vld [vmem:[#allocation28] ss:$0 sm:$0xff]  ;;  %v547_v44 = vld [vmem:[%s3052_s18 + $0x20] sm:$0xff] }
 0x55a   :  { %1707 = vmatmul.msk.f32.vlgmr.msra.gmra.mxu3 %vm691_vm7, %v2876_v21 }
 0x55b   :  { %1198 = vmatpush.msrb.mxu3 %v523_v34  ;;  %1250 = vmatpush.msra.mxu1 %v525_v45  ;;  %v554_v34 = vld [vmem:[%s3052_s18 + $0x58] sm:$0xff] }
 0x55c   :  { %1704 = vmatmul.msk.f32.gmra.mxu1 %vm691_vm7, %v2872_v20  ;;  %v546_v45 = vld [vmem:[%s3052_s18 + $0x18] sm:$0xff] }
 0x55d   :  { %1199 = vmatpush.msrb.mxu3 %v522_v42  ;;  %v548_v42 = vld [vmem:[%s3052_s18 + $0x28] sm:$0xff] }
 0x55f   :  { %1293 = vmatpush.msra.mxu3 %v533_v55 }
 0x561   :  { %1294 = vmatpush.msra.mxu3 %v532_v58 }
 0x562   :  { %1708 = vmatmul.msk.f32.gmra.mxu3 %vm691_vm7, %v2881_v22 }
 0x564   :  { %1711 = vmatmul.msk.f32.vlgmr.msrb.gmra.mxu1 %vm581_vm4, %v979_v5  ;;  %v536_v5 = vld [vmem:[#allocation29 + $0x8] sm:$0xff] }
 0x565   :  { %1342 = vmatpush.msrb.mxu1 %v531_v46  ;;  %v545_v46 = vld [vmem:[%s3052_s18 + $0x10] sm:$0xff] }
 0x567   :  { %1343 = vmatpush.msrb.mxu1 %v530_v47 }
 0x5d1   :  { %v1040_v13 = vpop.f32.mrf.mxu1 }
 0x5d9   :  { %v1043_v14 = vpop.f32.mrf.mxu1 }
 0x5dd   :  { %v1092_v16 = vpop.f32.mrf.mxu3 }
 0x5de   :  { %v1093_v17 = vadd.f32 %v1092_v16, %v1069_v15  ;;  %v539_v16 = vld [vmem:[#allocation31 + $0x8] sm:$0xff] }
 0x5e0   :  { %v1098_v23 = vadd.f32 %v1093_v17, %v1040_v13  ;;  %v538_v17 = vld [vmem:[#allocation31] sm:$0xff] }
 0x5e1   :  { %v1158_v24 = vpop.f32.mrf.mxu1 }
 0x5e2   :  { %v1103_v26 = vadd.f32 %v1809_v18, %v1098_v23  ;;  %1219 = vmatpush.msrb.mxu0 %v1158_v24 }
 0x5e4   :  { %v1105_v27 = vmax.f32 %v1103_v26, 0.0 }
 0x5e5   :  { %v1095_v29 = vpop.f32.mrf.mxu3 }
 0x5e6   :  { %v1096_v30 = vadd.f32 %v1095_v29, %v1072_v28  ;;  %1709 = vmatmul.msk.f32.vlgmr.msra.gmra.mxu0 %vm581_vm4, %v1105_v27 }
 0x5e8   :  { %v1099_v31 = vadd.f32 %v1096_v30, %v1043_v14  ;;  %v558_v30 = vld [vmem:[%s3052_s18 + $0x78] sm:$0xff] }
 0x5ea   :  { %v1104_v32 = vadd.f32 %v1809_v18, %v1099_v31  ;;  %v1814_v18 = vld [vmem:[%s3051_s3] ss:$0 sm:$0xff]  ;;  %v557_v31 = vld [vmem:[%s3052_s18 + $0x70] sm:$0xff] }
 0x5ec   :  { %v1106_v33 = vmax.f32 %v1104_v32, 0.0  ;;  %v556_v32 = vld [vmem:[%s3052_s18 + $0x68] sm:$0xff] }
 0x5ee   :  { %1710 = vmatmul.msk.f32.gmra.mxu0 %vm581_vm4, %v1106_v33  ;;  %v555_v33 = vld [vmem:[%s3052_s18 + $0x60] sm:$0xff] }
 0x5f6   :  { %1714 = vmatmul.msk.f32.vlgmr.msrb.gmra.mxu0 %vm691_vm7, %v2887_v25 }
 0x663   :  { %v1133_v35 = vpop.f32.mrf.mxu0 }
 0x664   :  { %v1134_v38 = vadd.f32 %v1810_v36, %v1133_v35  ;;  %v553_v35 = vld [vmem:[%s3052_s18 + $0x50] sm:$0xff] }
 0x666   :  { %v1139_v41 = vmax.f32 %v1134_v38, 0.0  ;;  %v550_v38 = vld [vmem:[%s3052_s18 + $0x38] sm:$0xff] }
 0x66b   :  { %v1136_v37 = vpop.f32.mrf.mxu0 }
 0x66c   :  { %v1137_v39 = vadd.f32 %v1810_v36, %v1136_v37  ;;  %v552_v36 = vld [vmem:[%s3052_s18 + $0x48] sm:$0xff]  ;;  %v551_v37 = vld [vmem:[%s3052_s18 + $0x40] sm:$0xff] }
 0x66e   :  { %v1140_v40 = vmax.f32 %v1137_v39, 0.0  ;;  %v1815_v39 = vld [vmem:[%s3053_s26] ss:$0 sm:$0xff] }
 0x670   :  { %1175 = vmatpush.msra.mxu2 %v1140_v40 }
 0x672   :  { %1176 = vmatpush.msra.mxu2 %v1139_v41 }
 0x673   :  { %1712 = vmatmul.msk.f32.vlgmr.msra.gmra.mxu2 %vm581_vm4, %v2853_v9  ;;  %v1221_v49 = vpop.f32.mrf.mxu0 }
 0x674   :  { %1273 = vmatpush.msrb.mxu2 %v529_v54  ;;  %v1816_v54 = vld [vmem:[%s3054_s25] ss:$0 sm:$0xff] }
 0x676   :  { %1274 = vmatpush.msrb.mxu2 %v528_v57 }
 0x6f6   :  { %v1178_v43 = vpop.f32.mrf.mxu2 }
 0x6f7   :  { %1713 = vmatmul.msk.f32.vlgmr.msrb.gmra.mxu3 %vm581_vm4, %v1178_v43 }
 0x6f8   :  { %1406 = vmatpush.msrb.mxu3 %v536_v5 }
 0x6fa   :  { %1407 = vmatpush.msrb.mxu3 %v535_v6 }
 0x77a   :  { %v1201_v50 = vpop.f32.mrf.mxu3 }
 0x77b   :  { %v1222_v51 = vadd.f32 %v1221_v49, %v1201_v50  ;;  %v543_v50 = vld [vmem:[%s3052_s18] sm:$0xff] }
 0x77d   :  { %v1227_v52 = vadd.f32 %v1811_v48, %v1222_v51  ;;  %v544_v48 = vld [vmem:[%s3052_s18 + $0x8] sm:$0xff] }
 0x77f   :  { %v1228_v53 = vmax.f32 %v1227_v52, 0.0  ;;  %v561_v52 = vld [vmem:[#allocation34 + $0x8] sm:$0xff] }
 0x781   :  { %1715 = vmatmul.msk.f32.vlgmr.msra.gmra.mxu1 %vm581_vm4, %v1228_v53  ;;  %v560_v53 = vld [vmem:[#allocation34] sm:$0xff] }
 0x782   :  { %1463 = vmatpush.msra.mxu1 %v542_v56 }
 0x784   :  { %1464 = vmatpush.msra.mxu1 %v541_v59 }
 0x789   :  { %1720 = vmatmul.msk.f32.vlgmr.msrb.gmra.mxu1 %vm581_vm4, %v1139_v41 }
 0x791   :  { %1721 = vmatmul.msk.f32.gmra.mxu1 %vm581_vm4, %v1140_v40  ;;  %v549_v40 = vld [vmem:[%s3052_s18 + $0x30] sm:$0xff] }
 0x7fe   :  { %v1252_v61 = vpop.f32.mrf.mxu1 }
 0x7ff   :  { %v1253_v62 = vadd.f32 %v1812_v60, %v1252_v61  ;;  %v564_v60 = vld [vmem:[#allocation35 + $0x8] sm:$0xff] }
 0x800   :  { %v1817_v61 = vld [vmem:[%s3055_s28] ss:$0 sm:$0xff] }
 0x801   :  { %v1255_v63 = vmax.f32 %v1253_v62, 0.0 }
 0x803   :  { %1716 = vmatmul.msk.f32.vlgmr.msrb.gmra.mxu2 %vm581_vm4, %v1255_v63  ;;  %1717 = vmatmul.msk.f32.vlgmr.msra.gmra.mxu3 %vm581_vm4, %v1255_v63 }
 0x804   :  { %1728 = vmatmul.msk.f32.vlgmr.msra.gmra.mxu1 %vm581_vm4, %v1255_v63  ;;  %1489 = vmatpush.msra.mxu3 %v558_v30 }
 0x806   :  { %v1345_v0 = vpop.f32.mrf.mxu1  ;;  %1490 = vmatpush.msra.mxu3 %v557_v31 }
 0x808   :  { %1491 = vmatpush.msra.mxu3 %v556_v32 }
 0x80a   :  { %1492 = vmatpush.msra.mxu3 %v555_v33 }
 0x80c   :  { %1493 = vmatpush.msra.mxu3 %v554_v34 }
 0x80e   :  { %v1348_v1 = vpop.f32.mrf.mxu1  ;;  %1494 = vmatpush.msra.mxu3 %v553_v35 }
 0x810   :  { %1495 = vmatpush.msra.mxu3 %v552_v36 }
 0x812   :  { %1496 = vmatpush.msra.mxu3 %v551_v37 }
 0x814   :  { %1497 = vmatpush.msra.mxu3 %v550_v38 }
 0x816   :  { %1498 = vmatpush.msra.mxu3 %v549_v40 }
 0x818   :  { %1499 = vmatpush.msra.mxu3 %v548_v42 }
 0x81a   :  { %1500 = vmatpush.msra.mxu3 %v547_v44 }
 0x81c   :  { %1501 = vmatpush.msra.mxu3 %v546_v45 }
 0x81e   :  { %1502 = vmatpush.msra.mxu3 %v545_v46 }
 0x820   :  { %1503 = vmatpush.msra.mxu3 %v544_v48 }
 0x822   :  { %1504 = vmatpush.msra.mxu3 %v543_v50 }
 0x881   :  { %v1466_v2 = vpop.f32.mrf.mxu1 }
 0x882   :  { %1524 = vmatpush.msrb.mxu1 %v1466_v2 }
 0x883   :  { %1730 = vmatmul.msk.f32.vlgmr.msrb.gmra.mxu1 %vm691_vm7, %v2887_v25 }
 0x886   :  { %v1276_v3 = vpop.f32.mrf.mxu2  ;;  %v1296_v4 = vpop.f32.mrf.mxu3 }
 0x887   :  { %1314 = vmatpush.msra.mxu0 %v1296_v4  ;;  %1366 = vmatpush.msra.mxu2 %v1276_v3 }
 0x888   :  { %1718 = vmatmul.msk.f32.vlgmr.msra.gmra.mxu0 %vm691_vm7, %v2868_v19  ;;  %1722 = vmatmul.msk.f32.vlgmr.msra.gmra.mxu2 %vm691_vm7, %v2876_v21 }
 0x889   :  { %1440 = vmatpush.msrb.mxu0 %v539_v16 }
 0x88b   :  { %1441 = vmatpush.msrb.mxu0 %v538_v17 }
 0x88d   :  { %1581 = vmatpush.msra.mxu0 %v564_v60 }
 0x890   :  { %1719 = vmatmul.msk.f32.gmra.mxu0 %vm691_vm7, %v2872_v20  ;;  %1723 = vmatmul.msk.f32.gmra.mxu2 %vm691_vm7, %v2881_v22 }
 0x900   :  { %v1526_v55 = vpop.f32.mrf.mxu1 }
 0x905   :  { %v1316_v25 = vpop.f32.mrf.mxu0 }
 0x90b   :  { %v1368_v7 = vpop.f32.mrf.mxu2 }
 0x90c   :  { %v1369_v8 = vadd.f32 %v1368_v7, %v1345_v0 }
 0x90d   :  { %v1319_v20 = vpop.f32.mrf.mxu0 }
 0x90e   :  { %v1374_v11 = vadd.f32 %v1369_v8, %v1316_v25 }
 0x910   :  { %v1379_v19 = vadd.f32 %v1813_v10, %v1374_v11 }
 0x912   :  { %v1381_v12 = vmax.f32 %v1379_v19, 0.0 }
 0x913   :  { %v1371_v13 = vpop.f32.mrf.mxu2 }
 0x914   :  { %v1372_v21 = vadd.f32 %v1371_v13, %v1348_v1  ;;  %1724 = vmatmul.msk.f32.vlgmr.msrb.gmra.mxu3 %vm581_vm4, %v1381_v12 }
 0x916   :  { %v1375_v14 = vadd.f32 %v1372_v21, %v1319_v20 }
 0x918   :  { %v1380_v15 = vadd.f32 %v1813_v10, %v1375_v14 }
 0x91a   :  { %v1382_v22 = vmax.f32 %v1380_v15, 0.0 }
 0x91c   :  { %1725 = vmatmul.msk.f32.gmra.mxu3 %vm581_vm4, %v1382_v22 }
 0x997   :  { %v1409_v23 = vpop.f32.mrf.mxu3 }
 0x998   :  { %v1410_v24 = vadd.f32 %v1814_v18, %v1409_v23 }
 0x99a   :  { %v1415_v26 = vmax.f32 %v1410_v24, 0.0 }
 0x99c   :  { %1726 = vmatmul.msk.f32.vlgmr.msrb.gmra.mxu0 %vm581_vm4, %v1415_v26 }
 0x99f   :  { %v1412_v27 = vpop.f32.mrf.mxu3 }
 0x9a0   :  { %v1413_v28 = vadd.f32 %v1814_v18, %v1412_v27 }
 0x9a2   :  { %v1416_v29 = vmax.f32 %v1413_v28, 0.0 }
 0x9a4   :  { %1727 = vmatmul.msk.f32.gmra.mxu0 %vm581_vm4, %v1416_v29 }
 0xa19   :  { %v1443_v41 = vpop.f32.mrf.mxu0 }
 0xa1a   :  { %v1444_v43 = vadd.f32 %v1815_v39, %v1443_v41 }
 0xa1c   :  { %1588 = vst [vmem:[#allocation38] sm:$0xff] %v1444_v43 }
 0xa21   :  { %v1446_v47 = vpop.f32.mrf.mxu0 }
 0xa22   :  { %v1447_v49 = vadd.f32 %v1815_v39, %v1446_v47 }
 0xa24   :  { %1589 = vst [vmem:[#allocation38 + $0x8] sm:$0xff] %v1447_v49  ;;  %1483 = vmatpush.msrb.mxu2 %v1447_v49 }
 0xa26   :  { %1484 = vmatpush.msrb.mxu2 %v1444_v43 }
 0xa27   :  { %1729 = vmatmul.msk.f32.vlgmr.msrb.gmra.mxu2 %vm581_vm4, %v2853_v9  ;;  %v563_v9 = vld [vmem:[#allocation35] sm:$0xff] }
 0xa28   :  { %1554 = vmatpush.msra.mxu2 %v561_v52  ;;  %1582 = vmatpush.msra.mxu0 %v563_v9 }
 0xa2a   :  { %1555 = vmatpush.msra.mxu2 %v560_v53 }
 0xaaa   :  { %v1486_v51 = vpop.f32.mrf.mxu2 }
 0xaab   :  { %1505 = vmatmul.f32.vlgmr.msra.gmra.mxu3 %v1486_v51 }
 0xb2e   :  { %v1506_v56 = vpop.f32.mrf.mxu3 }
 0xb2f   :  { %v1527_v57 = vadd.f32 %v1526_v55, %v1506_v56 }
 0xb31   :  { %v1532_v58 = vadd.f32 %v1816_v54, %v1527_v57 }
 0xb33   :  { %v1533_v59 = vmax.f32 %v1532_v58, 0.0 }
 0xb35   :  { %1731 = vmatmul.msk.f32.vlgmr.msra.gmra.mxu2 %vm581_vm4, %v1533_v59 }
 0xbb8   :  { %v1557_v62 = vpop.f32.mrf.mxu2 }
 0xbb9   :  { %v1558_v63 = vadd.f32 %v1817_v61, %v1557_v62 }
 0xbbb   :  { %v1560_v0 = vmax.f32 %v1558_v63, 0.0 }
 0xbbd   :  { %1732 = vmatmul.msk.f32.vlgmr.msra.gmra.mxu0 %vm581_vm4, %v1560_v0 }
 0xbbe   :  { %2370 = shalt.err (!%p2367_p2)
}
 0xbbf   :  { %1613 = dma.vmem_to_hbm [thread:$0]  %s1606_s19, 256, %s1608_s7, [#allocation39], %s2470_s6, %s2470_s6, %s2471_s13  }
 0xbc0   :  { %v1818_v1 = vld [vmem:[%s2700_s8] ss:$0 sm:$0xff]  ;;  %s2491_s20 = smov [#allocation37]   ;;  %s1597_s5 = sshll.u32 %s2705_s29, 4  ;;  %s1598_s5 = int_to_ptr.hbm [resolvable:$true] %s1597_s5 }
 0xbc1   :  { %s1595_s10 = sshll.u32 %s2491_s20, 4  ;;  %s2383_s27 = sshra.s32 %s1598_s5, 4  ;;  %s1596_s10 = int_to_ptr.vmem [resolvable:$true] %s1595_s10  ;;  %s2384_s27 = int_to_ptr.hbm [resolvable:$true] %s2383_s27 }
 0xbc2   :  { %s2385_s24 = scalar_lea.hbm %s2384_s27, 8  ;;  %s2387_s11 = scalar_lea.hbm %s2705_s29, 8 }
 0xbc3   :  { %p2386_p3 = scmp.ne.s32.totalorder %s2384_s27, %s2385_s24  ;;  %p2388_p4 = scmp.lt.s32.totalorder %s2384_s27, %s2705_s29 }
 0xbc4   :  { %p2389_p5 = scmp.lt.s32.totalorder %s2387_s11, %s2385_s24 }
 0xbc6   :  { %p2390_p6 = por %p2389_p5, %p2388_p4 }
 0xbc8   :  { %p2391_p7 = pnand %p2390_p6, %p2386_p3 }
 0xc3a   :  { %v1584_v2 = vpop.f32.mrf.mxu0 }
 0xc3b   :  { %v1585_v3 = vadd.f32 %v1818_v1, %v1584_v2 }
 0xc3d   :  { %1587 = vst [vmem:[#allocation37] sm:$0xff] %v1585_v3 }
 0xc3e   :  { %2394 = shalt.err (!%p2391_p7)
}
 0xc3f   :  { %1600 = dma.vmem_to_hbm [thread:$0]  %s1596_s10, 128, %s1598_s5, [#allocation4]  }
 0xc40   :  { %2419 = dma.done.wait [#allocation4], 128  }
 0xc41   :  { %2420 = vsyncadd [#allocation4], 4294967168 }
 0xc42   :  { %2421 = dma.done.wait [#allocation39], 256  }
 0xc43   :  { %2422 = vsyncadd [#allocation39], 4294967040 }
 0xc44   :  { %1622 = vsyncpa [#allocation3], 1 }
 0xc45   :  { %1623 = vsyncpa [#allocation6], 1 }
 0xc46   :  { %1624 = vsyncpa [#allocation9], 1 }
 0xc47   :  { %1625 = vsyncpa [#allocation12], 1 }
 0xc48   :  { %1626 = vsyncpa [#allocation15], 1 }
 0xc49   :  { %1627 = vsyncpa [#allocation18], 1 }
 0xc4a   :  { %1628 = vsyncpa [#allocation21], 1 }
 0xc4b   :  { %1629 = vsyncpa [#allocation24], 1 }
 0xc4c   :  { %1630 = vsyncpa [#allocation27], 1 }
 0xc4d   :  { %1631 = vsyncpa [#allocation30], 1 }
 0xc4e   :  { %1632 = vsyncpa [#allocation33], 1 }
 0xc4f   :  { %1633 = vsyncpa [#allocation36], 1 }
 0xc50   :  { %1634 = vsyncpa [#allocation4], 1 }
 0xc51   :  { %1635 = vsyncpa [#allocation39], 1 }

</bundles_post_ra>
